<compile_context>
chip_gen: v5e
topology: v5e:2x2
jax: 0.10.0
libtpu: 0.0.40
codegen_flags: <defaults>
</compile_context>

<pallas_src>
import numpy as np

import jax
import jax.numpy as jnp
from jax.experimental import pallas as pl
from jax.experimental.pallas import tpu as pltpu

# ---------------- synthetic (small) configuration ----------------
EMB_DIM = 16
NUM_EXPERTS = 3
LABELS = ("click", "like")
NUM_TASKS = len(LABELS)
EXPERT_UNITS = (64, 32)
GATE_UNITS = (32,)
TOWER_UNITS = (32,)
USER_TOWER_UNITS = (64, 32, 16)
BN_EPS = 1e-5

# feature_name -> (vocab_size, column_index)
CAT_FEATURES = {"user_id": (50, 0), "item_id": (100, 1), "item_cat": (20, 2)}
USER_FEATURES = ("user_id",)
CON_FEATURES = {"ctx0": (1, 3), "emp_click": (1, 4), "emp_like": (1, 5)}
# feature_name -> (vocab_size, (start_col, max_len))
VAR_FEATURES = {"hist_items": (100, (6, 4))}
NUM_COLS = 10

INPUT_DIM = EMB_DIM * (len(CAT_FEATURES) + len(VAR_FEATURES)) + len(CON_FEATURES)  # 67
USER_INPUT_DIM = EMB_DIM * (len(USER_FEATURES) + len(VAR_FEATURES)) + 1            # 33

# ---------------- derived fused-layout constants ----------------
DIN_ALL = INPUT_DIM + NUM_TASKS * USER_INPUT_DIM + 1          # 134  [x | u_t0 | u_t1 | 1]
H_EXP = NUM_EXPERTS * EXPERT_UNITS[0]                          # 192
H_GATE = NUM_TASKS * GATE_UNITS[0]                             # 64
H_USR = NUM_TASKS * USER_TOWER_UNITS[0]                        # 128
H_ALL = H_EXP + H_GATE + H_USR + 1                             # 385  (+ const lane)
D_EXP = EXPERT_UNITS[-1]                                       # 32
E_ALL = NUM_EXPERTS * D_EXP                                    # 96
C_EEXT = NUM_TASKS * E_ALL + 1                                 # 193  experts tiled per task + const
C_GL = NUM_TASKS * NUM_EXPERTS                                 # 6    gate logits
D_TWR = TOWER_UNITS[-1]                                        # 32
C_U2 = NUM_TASKS * USER_TOWER_UNITS[1] + 1                     # 65   user L2 + const
C_L2 = C_EEXT + C_GL + C_U2                                    # 264
C_TWR = NUM_TASKS * D_TWR + 1                                  # 65   tower out + const
TT = NUM_TASKS * D_TWR                                         # 64
D_U3 = NUM_TASKS * USER_TOWER_UNITS[2]                         # 32
HEAD_IN = TT + D_U3                                            # 96
OUT_DIM = 2 * NUM_TASKS                                        # 4

# ---------------- single packed weight buffer layout ----------------
_PACK_SPEC = (
    ("l1", DIN_ALL, H_ALL),        # (134, 385)  experts L1 ++ gates L1 ++ user L1 ++ const
    ("l2", H_ALL, C_L2),           # (385, 264)  experts L2 (tiled) ++ gate final ++ user L2
    ("gmix", C_GL, 2 * C_EEXT),    # (6,   386)  gate-prob repeat | group-denominator repeat
    ("mt", C_EEXT, C_TWR),         # (193, 65)   expert-sum fused with tower L1 (+bias row)
    ("qkv", C_TWR, 4 * TT),        # (65,  256)  [Q | K-diff | V | V-diff] block-diag (+bias row)
    ("spread", TT, TT),            # (64,  64)   per-task lane-sum broadcast * 1/sqrt(D)
    ("u3", C_U2, D_U3),            # (65,  32)   user L3 block-diag (+bias row)
    ("heads", HEAD_IN, OUT_DIM),   # (96,  4)    task heads ++ user heads
)


def _make_layout(spec):
    layout, off = {}, 0
    for name, r, c in spec:
        layout[name] = (off, r, c)
        off += -(-r // 8) * 8      # keep every sub-matrix sublane(8)-aligned in the pack
    return layout, off


_LAYOUT, PACK_ROWS = _make_layout(_PACK_SPEC)
PACK_COLS = max(c for _, _, c in _PACK_SPEC)                   # 386


# =====================  fused Pallas megakernel  =====================

def _mmoe_kernel(x_ref, w_ref, o_ref):
    f32 = jnp.float32

    def W(name):
        off, r, c = _LAYOUT[name]
        return w_ref[off:off + r, 0:c]          # static sublane/lane window of the pack

    x = x_ref[...]                                                      # (TB, 134)

    # ---- layer 1: experts L1 ++ gates L1 ++ user L1 (+const) — ONE GEMM, biases folded
    h = jnp.maximum(jnp.dot(x, W("l1"), preferred_element_type=f32), 0.0)     # (TB, 385)

    # ---- layer 2: experts L2 (tiled per task) ++ gate final ++ user L2 — ONE GEMM
    h2 = jnp.dot(h, W("l2"), preferred_element_type=f32)                      # (TB, 264)
    e_ext = jnp.maximum(h2[:, :C_EEXT], 0.0)                                  # (TB, 193) const lane = 1
    gl = h2[:, C_EEXT:C_EEXT + C_GL]                                          # (TB, 6)  gate logits
    u2 = jnp.maximum(h2[:, C_EEXT + C_GL:C_L2], 0.0)                          # (TB, 65) const lane = 1

    # ---- per-task softmax over experts + MoE mixture, fully vectorized ----
    gl = gl - jnp.max(gl, axis=-1, keepdims=True)          # row-constant shift: softmax invariant
    p_un = jnp.exp(gl)                                                        # (TB, 6)
    comb = jnp.dot(p_un, W("gmix"), preferred_element_type=f32)               # (TB, 386)
    p_rep = comb[:, :C_EEXT] * pl.reciprocal(comb[:, C_EEXT:], approx=True)   # (TB, 193) probs, const≈1
    weighted = p_rep * e_ext                                                  # (TB, 193) p_{t,k}*e_k

    # ---- expert-sum fused with task-tower L1 (bias via const lane), ReLU ----
    t_ext = jnp.maximum(jnp.dot(weighted, W("mt"), preferred_element_type=f32), 0.0)  # (TB, 65)

    # ---- task self-attention (T=2) + residual, no per-task loops ----
    qkv = jnp.dot(t_ext, W("qkv"), preferred_element_type=f32)                # (TB, 256)
    q = qkv[:, 0:TT]                      # [q0 | q1]
    kd = qkv[:, TT:2 * TT]                # [k0-k1 | k1-k0]
    v = qkv[:, 2 * TT:3 * TT]             # [v0 | v1]
    vd = qkv[:, 3 * TT:4 * TT]            # [v0-v1 | v1-v0]
    d_rep = jnp.dot(q * kd, W("spread"), preferred_element_type=f32)          # (TB, 64) score diffs
    a = jax.nn.sigmoid(d_rep)             # 2-way softmax == sigmoid of the score difference
    final = v + (a - 1.0) * vd + t_ext[:, 0:TT]                               # attention + residual

    # ---- user towers layer 3 ----
    u3 = jnp.maximum(jnp.dot(u2, W("u3"), preferred_element_type=f32), 0.0)   # (TB, 32)

    # ---- task heads + user heads in ONE GEMM, single (TB, 4) output store ----
    head_in = jnp.concatenate([final, u3], axis=1)                            # (TB, 96)
    logits = jnp.dot(head_in, W("heads"), preferred_element_type=f32)         # (TB, 4)
    o_ref[...] = jax.nn.sigmoid(logits).astype(o_ref.dtype)


def mmoe_fused_call(x_all, wpack):
    """Whole post-embedding forward in one pallas_call, batch-tiled grid."""
    B = x_all.shape[0]
    TB = min(256, B)                         # review: TB ~ 256-512, fits VMEM on v5e/v6e/v7x
    n_blocks = -(-B // TB)
    bp = n_blocks * TB
    if bp != B:
        x_all = jnp.pad(x_all, ((0, bp - B), (0, 0)))
    out = pl.pallas_call(
        _mmoe_kernel,
        out_shape=jax.ShapeDtypeStruct((bp, OUT_DIM), jnp.float32),
        grid=(n_blocks,),
        in_specs=[
            pl.BlockSpec((TB, DIN_ALL), lambda i: (i, 0)),                 # activations: tiled
            pl.BlockSpec((PACK_ROWS, PACK_COLS), lambda i: (0, 0)),        # weights: pinned in VMEM
        ],
        out_specs=pl.BlockSpec((TB, OUT_DIM), lambda i: (i, 0)),
        compiler_params=pltpu.CompilerParams(
            dimension_semantics=("parallel",)),   # 2x across TCs on v7x, no-op on v5e/v6e
    )(x_all, wpack)
    return out[:B]


# =====================  parameters  =====================

def _init_linear(key, din, dout, std=0.05):
    return jax.random.normal(key, (din, dout), jnp.float32) * std


def _init_dnn(key, din, units):
    """DNN = [Linear -> BatchNorm1d(eval) -> ReLU] per hidden unit."""
    layers = []
    dims = (din,) + tuple(units)
    keys = jax.random.split(key, len(units))
    for k, (a, b) in zip(keys, zip(dims[:-1], dims[1:])):
        w = _init_linear(k, a, b)
        bias = jnp.zeros((1, b), jnp.float32)
        # eval-mode BN with fresh running stats (mean=0, var=1, gamma=1, beta=0)
        bn_scale = jnp.full((1, b), 1.0 / jnp.sqrt(1.0 + BN_EPS), jnp.float32)
        bn_shift = jnp.zeros((1, b), jnp.float32)
        layers.append((w, bias, bn_scale, bn_shift))
    return layers


def init_params(key):
    keys = iter(jax.random.split(key, 64))
    p = {}
    emb = {}
    for name, (vocab, _) in CAT_FEATURES.items():
        emb[name] = jax.random.normal(next(keys), (vocab, EMB_DIM), jnp.float32) * 0.05
    for name, (vocab, _) in VAR_FEATURES.items():
        emb[name] = jax.random.normal(next(keys), (vocab, EMB_DIM), jnp.float32) * 0.05
    p["emb"] = emb
    p["expert"] = [_init_dnn(next(keys), INPUT_DIM, EXPERT_UNITS) for _ in range(NUM_EXPERTS)]
    p["gate"] = [_init_dnn(next(keys), INPUT_DIM, GATE_UNITS) for _ in range(NUM_TASKS)]
    p["gate_final"] = [_init_linear(next(keys), GATE_UNITS[-1], NUM_EXPERTS)
                       for _ in range(NUM_TASKS)]
    p["tower"] = [_init_dnn(next(keys), EXPERT_UNITS[-1], TOWER_UNITS) for _ in range(NUM_TASKS)]
    p["tower_final"] = [_init_linear(next(keys), TOWER_UNITS[-1], 1) for _ in range(NUM_TASKS)]
    p["user_tower"] = [_init_dnn(next(keys), USER_INPUT_DIM, USER_TOWER_UNITS)
                       for _ in range(NUM_TASKS)]
    p["user_final"] = [_init_linear(next(keys), USER_TOWER_UNITS[-1], 1) for _ in range(NUM_TASKS)]
    d = TOWER_UNITS[-1]
    p["attn"] = {
        "wq": _init_linear(next(keys), d, d), "bq": jnp.zeros((1, d), jnp.float32),
        "wk": _init_linear(next(keys), d, d), "bk": jnp.zeros((1, d), jnp.float32),
        "wv": _init_linear(next(keys), d, d), "bv": jnp.zeros((1, d), jnp.float32),
    }
    return p


def prepare_packed_params(p):
    """One-time prep: fold eval-mode BN, fold biases via const lanes, and build
    the single packed weight buffer."""
    def fold(layer):
        w, b, s, t = layer
        # TODO(synk): with trained checkpoints fold the real running_mean/var and affine params.
        return np.asarray(w * s, np.float32), np.asarray(b * s + t, np.float32)[0]

    exp1 = [fold(p["expert"][e][0]) for e in range(NUM_EXPERTS)]
    exp2 = [fold(p["expert"][e][1]) for e in range(NUM_EXPERTS)]
    gat1 = [fold(p["gate"][t][0]) for t in range(NUM_TASKS)]
    gfin = [np.asarray(p["gate_final"][t], np.float32) for t in range(NUM_TASKS)]
    twr1 = [fold(p["tower"][t][0]) for t in range(NUM_TASKS)]
    tfin = [np.asarray(p["tower_final"][t], np.float32) for t in range(NUM_TASKS)]
    usr1 = [fold(p["user_tower"][t][0]) for t in range(NUM_TASKS)]
    usr2 = [fold(p["user_tower"][t][1]) for t in range(NUM_TASKS)]
    usr3 = [fold(p["user_tower"][t][2]) for t in range(NUM_TASKS)]
    ufin = [np.asarray(p["user_final"][t], np.float32) for t in range(NUM_TASKS)]
    wq = np.asarray(p["attn"]["wq"], np.float32); bq = np.asarray(p["attn"]["bq"], np.float32)[0]
    wk = np.asarray(p["attn"]["wk"], np.float32)
    wv = np.asarray(p["attn"]["wv"], np.float32); bv = np.asarray(p["attn"]["bv"], np.float32)[0]

    mats = {}

    # --- L1: experts L1 ++ gates L1 ++ user L1, biases in the ones row, const out lane ---
    L1 = np.zeros((DIN_ALL, H_ALL), np.float32)
    ONE_ROW = DIN_ALL - 1
    for e, (w, b) in enumerate(exp1):
        c0 = e * EXPERT_UNITS[0]
        L1[:INPUT_DIM, c0:c0 + EXPERT_UNITS[0]] = w
        L1[ONE_ROW, c0:c0 + EXPERT_UNITS[0]] = b
    for t, (w, b) in enumerate(gat1):
        c0 = H_EXP + t * GATE_UNITS[0]
        L1[:INPUT_DIM, c0:c0 + GATE_UNITS[0]] = w
        L1[ONE_ROW, c0:c0 + GATE_UNITS[0]] = b
    for t, (w, b) in enumerate(usr1):
        r0 = INPUT_DIM + t * USER_INPUT_DIM
        c0 = H_EXP + H_GATE + t * USER_TOWER_UNITS[0]
        L1[r0:r0 + USER_INPUT_DIM, c0:c0 + USER_TOWER_UNITS[0]] = w
        L1[ONE_ROW, c0:c0 + USER_TOWER_UNITS[0]] = b
    L1[ONE_ROW, H_ALL - 1] = 1.0
    mats["l1"] = L1

    # --- L2: experts L2 (block-diag, tiled per task) ++ gate-final ++ user L2 ---
    L2 = np.zeros((H_ALL, C_L2), np.float32)
    CONST_ROW = H_ALL - 1
    W2_bd = np.zeros((H_EXP, E_ALL), np.float32)
    b2 = np.zeros((E_ALL,), np.float32)
    for e, (w, b) in enumerate(exp2):
        W2_bd[e * EXPERT_UNITS[0]:(e + 1) * EXPERT_UNITS[0], e * D_EXP:(e + 1) * D_EXP] = w
        b2[e * D_EXP:(e + 1) * D_EXP] = b
    for t in range(NUM_TASKS):
        L2[:H_EXP, t * E_ALL:(t + 1) * E_ALL] = W2_bd
        L2[CONST_ROW, t * E_ALL:(t + 1) * E_ALL] = b2
    L2[CONST_ROW, C_EEXT - 1] = 1.0                       # const lane for tower/qkv bias chain
    for t in range(NUM_TASKS):
        r0 = H_EXP + t * GATE_UNITS[0]
        L2[r0:r0 + GATE_UNITS[0], C_EEXT + t * NUM_EXPERTS:C_EEXT + (t + 1) * NUM_EXPERTS] = gfin[t]
    for t, (w, b) in enumerate(usr2):
        r0 = H_EXP + H_GATE + t * USER_TOWER_UNITS[0]
        c0 = C_EEXT + C_GL + t * USER_TOWER_UNITS[1]
        L2[r0:r0 + USER_TOWER_UNITS[0], c0:c0 + USER_TOWER_UNITS[1]] = w
        L2[CONST_ROW, c0:c0 + USER_TOWER_UNITS[1]] = b
    L2[CONST_ROW, C_L2 - 1] = 1.0                         # const lane for user-L3 bias chain
    mats["l2"] = L2

    # --- GMIX: repeat gate probs over their 32-lane expert slabs | group denominators ---
    GM = np.zeros((C_GL, 2 * C_EEXT), np.float32)
    for t in range(NUM_TASKS):
        for k in range(NUM_EXPERTS):
            row = t * NUM_EXPERTS + k
            GM[row, t * E_ALL + k * D_EXP:t * E_ALL + (k + 1) * D_EXP] = 1.0
            GM[row, C_EEXT + t * E_ALL:C_EEXT + (t + 1) * E_ALL] = 1.0
    GM[:, C_EEXT - 1] = 1.0          # const lane: numerator == denominator -> ratio 1
    GM[:, 2 * C_EEXT - 1] = 1.0
    mats["gmix"] = GM

    # --- MT: (sum over experts) composed with tower L1 block-diag, bias in const row ---
    Wt_bd = np.zeros((NUM_TASKS * D_EXP, TT), np.float32)
    bt = np.zeros((TT,), np.float32)
    for t, (w, b) in enumerate(twr1):
        Wt_bd[t * D_EXP:(t + 1) * D_EXP, t * D_TWR:(t + 1) * D_TWR] = w
        bt[t * D_TWR:(t + 1) * D_TWR] = b
    Msum = np.zeros((NUM_TASKS * E_ALL, NUM_TASKS * D_EXP), np.float32)
    eye = np.eye(D_EXP, dtype=np.float32)
    for t in range(NUM_TASKS):
        for k in range(NUM_EXPERTS):
            Msum[t * E_ALL + k * D_EXP:t * E_ALL + (k + 1) * D_EXP,
                 t * D_EXP:(t + 1) * D_EXP] = eye
    MT = np.zeros((C_EEXT, C_TWR), np.float32)
    MT[:NUM_TASKS * E_ALL, :TT] = Msum @ Wt_bd
    MT[C_EEXT - 1, :TT] = bt
    MT[C_EEXT - 1, C_TWR - 1] = 1.0
    mats["mt"] = MT

    # --- QKV: block-diag over tasks, emitting [Q | K-diff | V | V-diff], bias in const row ---
    QKV = np.zeros((C_TWR, 4 * TT), np.float32)
    BR = C_TWR - 1
    for t in range(NUM_TASKS):
        o = 1 - t
        rt = slice(t * D_TWR, (t + 1) * D_TWR)
        ro = slice(o * D_TWR, (o + 1) * D_TWR)
        cq = slice(t * D_TWR, (t + 1) * D_TWR)
        QKV[rt, cq] = wq
        QKV[BR, cq] = bq
        ck = slice(TT + t * D_TWR, TT + (t + 1) * D_TWR)          # k_t - k_other (bias cancels)
        QKV[rt, ck] += wk
        QKV[ro, ck] -= wk
        cv = slice(2 * TT + t * D_TWR, 2 * TT + (t + 1) * D_TWR)
        QKV[rt, cv] = wv
        QKV[BR, cv] = bv
        cd = slice(3 * TT + t * D_TWR, 3 * TT + (t + 1) * D_TWR)  # v_t - v_other (bias cancels)
        QKV[rt, cd] += wv
        QKV[ro, cd] -= wv
    mats["qkv"] = QKV

    # --- SPREAD: per-task lane-sum broadcast back to 32 lanes, scaled by 1/sqrt(D) ---
    SP = np.zeros((TT, TT), np.float32)
    scale = 1.0 / np.sqrt(np.float32(D_TWR))
    for t in range(NUM_TASKS):
        SP[t * D_TWR:(t + 1) * D_TWR, t * D_TWR:(t + 1) * D_TWR] = scale
    mats["spread"] = SP

    # --- U3: user L3 block-diag, bias in const row ---
    U3 = np.zeros((C_U2, D_U3), np.float32)
    for t, (w, b) in enumerate(usr3):
        U3[t * USER_TOWER_UNITS[1]:(t + 1) * USER_TOWER_UNITS[1],
           t * USER_TOWER_UNITS[2]:(t + 1) * USER_TOWER_UNITS[2]] = w
        U3[C_U2 - 1, t * USER_TOWER_UNITS[2]:(t + 1) * USER_TOWER_UNITS[2]] = b
    mats["u3"] = U3

    # --- HEADS: task heads ++ user heads (no bias) ---
    HD = np.zeros((HEAD_IN, OUT_DIM), np.float32)
    for t in range(NUM_TASKS):
        HD[t * D_TWR:(t + 1) * D_TWR, t] = tfin[t][:, 0]
        HD[TT + t * USER_TOWER_UNITS[2]:TT + (t + 1) * USER_TOWER_UNITS[2],
           NUM_TASKS + t] = ufin[t][:, 0]
    mats["heads"] = HD

    pack = np.zeros((PACK_ROWS, PACK_COLS), np.float32)
    for name, (off, r, c) in _LAYOUT.items():
        m = mats[name]
        assert m.shape == (r, c), (name, m.shape, (r, c))
        pack[off:off + r, :c] = m
    return {"emb": p["emb"], "wpack": jnp.asarray(pack)}


# =====================  forward pass  =====================

@jax.jit
def mmoe_asd_forward(packed, x):
    emb = packed["emb"]
    B = x.shape[0]

    # ---- embedding / input assembly (plain-JAX glue: gathers, concats) ----
    cat_embeds, user_cat_embeds = [], []
    for name, (_, col) in CAT_FEATURES.items():
        idx = x[:, col].astype(jnp.int32)
        e = emb[name][idx]
        cat_embeds.append(e)
        if name in USER_FEATURES:
            user_cat_embeds.append(e)          # detach() only affects grads; forward identical
    con_embeds = [x[:, col][:, None] for _, (_, col) in CON_FEATURES.items()]
    varlen_embeds = []
    for name, (_, (start, maxlen)) in VAR_FEATURES.items():
        seq = x[:, start:start + maxlen].astype(jnp.int32)
        e = emb[name][seq]
        # TODO(synk): get_varlen_pooling_list not provided; approximated as mean over max_len.
        varlen_embeds.append(jnp.mean(e, axis=1))

    cat_embed = jnp.concatenate(cat_embeds, axis=1)
    con_embed = jnp.concatenate(con_embeds, axis=1)
    var_embed = jnp.concatenate(varlen_embeds, axis=1)
    user_cat_embed = jnp.concatenate(user_cat_embeds, axis=1)

    dnn_input = jnp.concatenate([cat_embed, con_embed, var_embed], axis=1)   # (B, 67)
    user_dnn_input = jnp.concatenate([user_cat_embed, var_embed], axis=1)    # (B, 32)

    # combined kernel input: [dnn_input | user_task0 | user_task1 | ones] -> (B, 134)
    blocks = [dnn_input]
    for label in LABELS:
        emp = x[:, CON_FEATURES["emp_" + label][1]][:, None]
        blocks.append(jnp.concatenate([user_dnn_input, emp], axis=1))        # (B, 33)
    blocks.append(jnp.ones((B, 1), jnp.float32))                             # bias-fold ones lane
    x_all = jnp.concatenate(blocks, axis=1).astype(jnp.float32)

    out = mmoe_fused_call(x_all, packed["wpack"])                            # (B, 4)
    return out[:, :NUM_TASKS], out[:, NUM_TASKS:]


# =====================  driver  =====================

if __name__ == "__main__":
    key = jax.random.PRNGKey(0)
    pkey, xkey = jax.random.split(key)
    params = init_params(pkey)
    packed = prepare_packed_params(params)

    B = 8
    k1, k2, k3 = jax.random.split(xkey, 3)
    cat_ids = jnp.stack(
        [
            jax.random.randint(jax.random.fold_in(k1, 0), (B,), 0, 50),
            jax.random.randint(jax.random.fold_in(k1, 1), (B,), 0, 100),
            jax.random.randint(jax.random.fold_in(k1, 2), (B,), 0, 20),
        ],
        axis=1,
    ).astype(jnp.float32)
    con = jax.random.uniform(k2, (B, len(CON_FEATURES)), jnp.float32)
    hist = jax.random.randint(k3, (B, 4), 0, 100).astype(jnp.float32)
    x = jnp.concatenate([cat_ids, con, hist], axis=1)        # (B, NUM_COLS)
    assert x.shape == (B, NUM_COLS)

    task_outs, user_weights = mmoe_asd_forward(packed, x)
    (task_outs, user_weights) = jax.block_until_ready((task_outs, user_weights))
    assert task_outs.shape == (B, NUM_TASKS)
    assert user_weights.shape == (B, NUM_TASKS)
    assert bool(jnp.all(jnp.isfinite(task_outs))) and bool(jnp.all(jnp.isfinite(user_weights)))
    assert bool(jnp.all((task_outs >= 0) & (task_outs <= 1)))
    assert bool(jnp.all((user_weights >= 0) & (user_weights <= 1)))
    print("KERNEL_OK")
</pallas_src>

<mosaic_0001>
module attributes {stable_mosaic.version = 11 : i64} {
  func.func @_mmoe_kernel(%arg0: i32, %arg1: memref<8x134xf32, #tpu.memory_space<vmem>>, %arg2: memref<1040x386xf32, #tpu.memory_space<vmem>>, %arg3: memref<8x4xf32, #tpu.memory_space<vmem>>) attributes {dimension_semantics = [#tpu.dimension_semantics<parallel>], iteration_bounds = array<i64: 1>, scalar_prefetch = 0 : i64, scratch_operands = 0 : i64, tpu.core_type = #tpu.core_type<tc>, window_params = [{transform_indices = @transform_0, window_bounds = array<i64: 8, 134>}, {pipeline_mode = #tpu.pipeline_mode<synchronous>, transform_indices = @transform_1, window_bounds = array<i64: 1040, 386>}, {transform_indices = @transform_2, window_bounds = array<i64: 8, 4>}]} {
    %c0 = arith.constant 0 : index
    %c0_0 = arith.constant 0 : index
    %0 = vector.load %arg1[%c0, %c0_0] : memref<8x134xf32, #tpu.memory_space<vmem>>, vector<8x134xf32>
    %c0_1 = arith.constant 0 : index
    %c0_2 = arith.constant 0 : index
    %1 = vector.load %arg2[%c0_1, %c0_2] : memref<1040x386xf32, #tpu.memory_space<vmem>>, vector<134x385xf32>
    %cst = arith.constant dense<0.000000e+00> : vector<8x385xf32>
    %2 = tpu.matmul %0, %1, %cst {dimension_numbers = #tpu.dot_dimension_numbers<[1], [0], [0], [1], [0, 0, 1, 1], [], []>} : vector<8x134xf32>, vector<134x385xf32>, vector<8x385xf32> -> vector<8x385xf32>
    %cst_3 = arith.constant 0.000000e+00 : f32
    %3 = vector.broadcast %cst_3 : f32 to vector<8x385xf32>
    %4 = arith.maximumf %2, %3 : vector<8x385xf32>
    %c136 = arith.constant 136 : index
    %c0_4 = arith.constant 0 : index
    %5 = vector.load %arg2[%c136, %c0_4] : memref<1040x386xf32, #tpu.memory_space<vmem>>, vector<385x264xf32>
    %cst_5 = arith.constant dense<0.000000e+00> : vector<8x264xf32>
    %6 = tpu.matmul %4, %5, %cst_5 {dimension_numbers = #tpu.dot_dimension_numbers<[1], [0], [0], [1], [0, 0, 1, 1], [], []>} : vector<8x385xf32>, vector<385x264xf32>, vector<8x264xf32> -> vector<8x264xf32>
    %7 = vector.extract_strided_slice %6 {offsets = [0, 0], sizes = [8, 193], strides = [1, 1]} : vector<8x264xf32> to vector<8x193xf32>
    %cst_6 = arith.constant 0.000000e+00 : f32
    %8 = vector.broadcast %cst_6 : f32 to vector<8x193xf32>
    %9 = arith.maximumf %7, %8 : vector<8x193xf32>
    %10 = vector.extract_strided_slice %6 {offsets = [0, 193], sizes = [8, 6], strides = [1, 1]} : vector<8x264xf32> to vector<8x6xf32>
    %11 = vector.extract_strided_slice %6 {offsets = [0, 199], sizes = [8, 65], strides = [1, 1]} : vector<8x264xf32> to vector<8x65xf32>
    %cst_7 = arith.constant 0.000000e+00 : f32
    %12 = vector.broadcast %cst_7 : f32 to vector<8x65xf32>
    %13 = arith.maximumf %11, %12 : vector<8x65xf32>
    %cst_8 = arith.constant dense<0xFF800000> : vector<8xf32>
    %14 = vector.multi_reduction <maximumf>, %10, %cst_8 [1] : vector<8x6xf32> to vector<8xf32>
    %15 = vector.shape_cast %14 : vector<8xf32> to vector<8x1xf32>
    %16 = vector.broadcast %15 : vector<8x1xf32> to vector<8x6xf32>
    %17 = arith.subf %10, %16 : vector<8x6xf32>
    %18 = math.exp %17 : vector<8x6xf32>
    %c528 = arith.constant 528 : index
    %c0_9 = arith.constant 0 : index
    %19 = vector.load %arg2[%c528, %c0_9] : memref<1040x386xf32, #tpu.memory_space<vmem>>, vector<6x386xf32>
    %cst_10 = arith.constant dense<0.000000e+00> : vector<8x386xf32>
    %20 = tpu.matmul %18, %19, %cst_10 {dimension_numbers = #tpu.dot_dimension_numbers<[1], [0], [0], [1], [0, 0, 1, 1], [], []>} : vector<8x6xf32>, vector<6x386xf32>, vector<8x386xf32> -> vector<8x386xf32>
    %21 = vector.extract_strided_slice %20 {offsets = [0, 0], sizes = [8, 193], strides = [1, 1]} : vector<8x386xf32> to vector<8x193xf32>
    %22 = vector.extract_strided_slice %20 {offsets = [0, 193], sizes = [8, 193], strides = [1, 1]} : vector<8x386xf32> to vector<8x193xf32>
    %23 = tpu.reciprocal %22 {approx = true} : vector<8x193xf32> -> vector<8x193xf32>
    %24 = arith.mulf %21, %23 : vector<8x193xf32>
    %25 = arith.mulf %24, %9 : vector<8x193xf32>
    %c536 = arith.constant 536 : index
    %c0_11 = arith.constant 0 : index
    %26 = vector.load %arg2[%c536, %c0_11] : memref<1040x386xf32, #tpu.memory_space<vmem>>, vector<193x65xf32>
    %cst_12 = arith.constant dense<0.000000e+00> : vector<8x65xf32>
    %27 = tpu.matmul %25, %26, %cst_12 {dimension_numbers = #tpu.dot_dimension_numbers<[1], [0], [0], [1], [0, 0, 1, 1], [], []>} : vector<8x193xf32>, vector<193x65xf32>, vector<8x65xf32> -> vector<8x65xf32>
    %cst_13 = arith.constant 0.000000e+00 : f32
    %28 = vector.broadcast %cst_13 : f32 to vector<8x65xf32>
    %29 = arith.maximumf %27, %28 : vector<8x65xf32>
    %c736 = arith.constant 736 : index
    %c0_14 = arith.constant 0 : index
    %30 = vector.load %arg2[%c736, %c0_14] : memref<1040x386xf32, #tpu.memory_space<vmem>>, vector<65x256xf32>
    %cst_15 = arith.constant dense<0.000000e+00> : vector<8x256xf32>
    %31 = tpu.matmul %29, %30, %cst_15 {dimension_numbers = #tpu.dot_dimension_numbers<[1], [0], [0], [1], [0, 0, 1, 1], [], []>} : vector<8x65xf32>, vector<65x256xf32>, vector<8x256xf32> -> vector<8x256xf32>
    %32 = vector.extract_strided_slice %31 {offsets = [0, 0], sizes = [8, 64], strides = [1, 1]} : vector<8x256xf32> to vector<8x64xf32>
    %33 = vector.extract_strided_slice %31 {offsets = [0, 64], sizes = [8, 64], strides = [1, 1]} : vector<8x256xf32> to vector<8x64xf32>
    %34 = vector.extract_strided_slice %31 {offsets = [0, 128], sizes = [8, 64], strides = [1, 1]} : vector<8x256xf32> to vector<8x64xf32>
    %35 = vector.extract_strided_slice %31 {offsets = [0, 192], sizes = [8, 64], strides = [1, 1]} : vector<8x256xf32> to vector<8x64xf32>
    %36 = arith.mulf %32, %33 : vector<8x64xf32>
    %c808 = arith.constant 808 : index
    %c0_16 = arith.constant 0 : index
    %37 = vector.load %arg2[%c808, %c0_16] : memref<1040x386xf32, #tpu.memory_space<vmem>>, vector<64x64xf32>
    %cst_17 = arith.constant dense<0.000000e+00> : vector<8x64xf32>
    %38 = tpu.matmul %36, %37, %cst_17 {dimension_numbers = #tpu.dot_dimension_numbers<[1], [0], [0], [1], [0, 0, 1, 1], [], []>} : vector<8x64xf32>, vector<64x64xf32>, vector<8x64xf32> -> vector<8x64xf32>
    %39 = arith.negf %38 : vector<8x64xf32>
    %40 = math.exp %39 : vector<8x64xf32>
    %cst_18 = arith.constant 1.000000e+00 : f32
    %41 = vector.broadcast %cst_18 : f32 to vector<8x64xf32>
    %42 = arith.addf %41, %40 : vector<8x64xf32>
    %43 = arith.divf %41, %42 : vector<8x64xf32>
    %cst_19 = arith.constant 1.000000e+00 : f32
    %44 = vector.broadcast %cst_19 : f32 to vector<8x64xf32>
    %45 = arith.subf %43, %44 : vector<8x64xf32>
    %46 = arith.mulf %45, %35 : vector<8x64xf32>
    %47 = arith.addf %34, %46 : vector<8x64xf32>
    %48 = vector.extract_strided_slice %29 {offsets = [0, 0], sizes = [8, 64], strides = [1, 1]} : vector<8x65xf32> to vector<8x64xf32>
    %49 = arith.addf %47, %48 : vector<8x64xf32>
    %c872 = arith.constant 872 : index
    %c0_20 = arith.constant 0 : index
    %50 = vector.load %arg2[%c872, %c0_20] : memref<1040x386xf32, #tpu.memory_space<vmem>>, vector<65x32xf32>
    %cst_21 = arith.constant dense<0.000000e+00> : vector<8x32xf32>
    %51 = tpu.matmul %13, %50, %cst_21 {dimension_numbers = #tpu.dot_dimension_numbers<[1], [0], [0], [1], [0, 0, 1, 1], [], []>} : vector<8x65xf32>, vector<65x32xf32>, vector<8x32xf32> -> vector<8x32xf32>
    %cst_22 = arith.constant 0.000000e+00 : f32
    %52 = vector.broadcast %cst_22 : f32 to vector<8x32xf32>
    %53 = arith.maximumf %51, %52 : vector<8x32xf32>
    %54 = tpu.concatenate %49, %53 in 1 : vector<8x64xf32>, vector<8x32xf32> -> vector<8x96xf32>
    %c944 = arith.constant 944 : index
    %c0_23 = arith.constant 0 : index
    %55 = vector.load %arg2[%c944, %c0_23] : memref<1040x386xf32, #tpu.memory_space<vmem>>, vector<96x4xf32>
    %cst_24 = arith.constant dense<0.000000e+00> : vector<8x4xf32>
    %56 = tpu.matmul %54, %55, %cst_24 {dimension_numbers = #tpu.dot_dimension_numbers<[1], [0], [0], [1], [0, 0, 1, 1], [], []>} : vector<8x96xf32>, vector<96x4xf32>, vector<8x4xf32> -> vector<8x4xf32>
    %57 = arith.negf %56 : vector<8x4xf32>
    %58 = math.exp %57 : vector<8x4xf32>
    %cst_25 = arith.constant 1.000000e+00 : f32
    %59 = vector.broadcast %cst_25 : f32 to vector<8x4xf32>
    %60 = arith.addf %59, %58 : vector<8x4xf32>
    %61 = arith.divf %59, %60 : vector<8x4xf32>
    %c0_26 = arith.constant 0 : index
    %c0_27 = arith.constant 0 : index
    %62 = vector.load %arg3[%c0_26, %c0_27] : memref<8x4xf32, #tpu.memory_space<vmem>>, vector<8x4xf32>
    tpu.vector_store %arg3[%c0_26, %c0_27], %61 {strides = array<i32>} : memref<8x4xf32, #tpu.memory_space<vmem>>, vector<8x4xf32>,
    return
  }
  func.func @transform_0(%arg0: i32) -> (i32, i32) {
    %c0_i32 = arith.constant 0 : i32
    %c0_i32_0 = arith.constant 0 : i32
    return %arg0, %c0_i32 : i32, i32
  }
  func.func @transform_1(%arg0: i32) -> (i32, i32) {
    %c0_i32 = arith.constant 0 : i32
    %c0_i32_0 = arith.constant 0 : i32
    %c0_i32_1 = arith.constant 0 : i32
    return %c0_i32, %c0_i32_0 : i32, i32
  }
  func.func @transform_2(%arg0: i32) -> (i32, i32) {
    %c0_i32 = arith.constant 0 : i32
    %c0_i32_0 = arith.constant 0 : i32
    return %arg0, %c0_i32 : i32, i32
  }
}

</mosaic_0001>

<bundles_post_ra>
// kernel: mmoe_asd_forward.1
= control target key start
LH: loop header
LB: loop body
LE: loop exit
PB: predicated region body
PF: predicated region fallthrough
CT: control target
= control target key end

     0   :  { %vm85_vm0 = vcmask 1045504   ;;  %vm81_vm1 = vcmask 48128   ;;  %vm413_vm2 = vcmask 1040384   ;;  %vm409_vm3 = vcmask 7168   ;;  %s1162_s18 = smov 63   ;;  %s1163_s21 = smov 57   ;;  %s2139_s1 = inlined_call_operand.vmem [shape: f32[1040,386], index: 1, kind: input, shape index: {}]   ;;  %s2140_s0 = inlined_call_operand.vmem [shape: f32[8,134], index: 0, kind: input, shape index: {}]   ;;  %s2141_s2 = inlined_call_operand.vmem [shape: f32[8,4], index: 2, kind: output, shape index: {}]  }
   0x1   :  { %v73_v0 = vld [vmem:[%s2139_s1 + $0x1e0] sm:$0xff]  ;;  %v74_v2 = vld [vmem:[%s2139_s1 + $0x1e8] sm:$0xff]  ;;  %v75_v4 = vld [vmem:[%s2139_s1 + $0x1f0] sm:$0xff]  ;;  %vm666_vm4 = vcmask 581128   ;;  %vm786_vm5 = vcmask 515072   ;;  %vm820_vm6 = vcmask 531456  }
   0x2   :  { %v77_v1 = vld [vmem:[%s2139_s1 + $0x200] sm:$0x3f]  ;;  %98 = vmatpush.msra.mxu0 %v73_v0  ;;  %v78_v3 = vld [vmem:[%s2139_s1 + $0x208] sm:$0x3f]  ;;  %v79_v5 = vld [vmem:[%s2139_s1 + $0x210] sm:$0x3f]  ;;  %138 = vmatpush.msra.mxu2 %v74_v2 }
   0x3   :  { %1108 = vmatpush.msk.msra.mxu1 %vm85_vm0, %v77_v1  ;;  %1110 = vmatpush.msk.msra.mxu3 %vm85_vm0, %v78_v3  ;;  %v69_v6 = vld [vmem:[%s2139_s1 + $0x1c0] sm:$0xff]  ;;  %v70_v7 = vld [vmem:[%s2139_s1 + $0x1c8] sm:$0xff]  ;;  %v76_v9 = vld [vmem:[%s2139_s1 + $0x1f8] sm:$0xff]  ;;  %vm1014_vm7 = vcmask 465920   ;;  %s1164_s24 = smov 64   ;;  %vm948_vm8 = vcmask 523264  }
   0x4   :  { %v1209_v8 = vld [vmem:[%s2140_s0 + $0x8] sm:$0xff]  ;;  %v71_v10 = vld [vmem:[%s2139_s1 + $0x1d0] sm:$0xff]  ;;  %v65_v11 = vld [vmem:[%s2139_s1 + $0x1a0] sm:$0xff]  ;;  %99 = vmatpush.msra.mxu0 %v69_v6  ;;  %139 = vmatpush.msra.mxu2 %v70_v7  ;;  %vm1059_vm13 = vcmask 785408  }
   0x5   :  { %178 = vmatpush.msrb.mxu1 %v75_v4  ;;  %1112 = vmatpush.msk.msrb.mxu3 %vm85_vm0, %v79_v5  ;;  %v66_v12 = vld [vmem:[%s2139_s1 + $0x1a8] sm:$0xff]  ;;  %v67_v13 = vld [vmem:[%s2139_s1 + $0x1b0] sm:$0xff]  ;;  %v72_v14 = vld [vmem:[%s2139_s1 + $0x1d8] sm:$0xff] }
   0x6   :  { %1111 = vmatmul.msk.f32.vlgmr.msra.gmra.mxu3 %vm81_vm1, %v1209_v8  ;;  %v61_v15 = vld [vmem:[%s2139_s1 + $0x180] sm:$0xff]  ;;  %100 = vmatpush.msra.mxu0 %v65_v11  ;;  %v62_v16 = vld [vmem:[%s2139_s1 + $0x188] sm:$0xff]  ;;  %v63_v17 = vld [vmem:[%s2139_s1 + $0x190] sm:$0xff] }
   0x7   :  { %179 = vmatpush.msrb.mxu1 %v71_v10  ;;  %218 = vmatpush.msra.mxu3 %v76_v9  ;;  %v68_v18 = vld [vmem:[%s2139_s1 + $0x1b8] sm:$0xff]  ;;  %v57_v19 = vld [vmem:[%s2139_s1 + $0x160] sm:$0xff]  ;;  %v58_v20 = vld [vmem:[%s2139_s1 + $0x168] sm:$0xff] }
   0x8   :  { %140 = vmatpush.msra.mxu2 %v66_v12  ;;  %101 = vmatpush.msra.mxu0 %v61_v15  ;;  %v59_v21 = vld [vmem:[%s2139_s1 + $0x170] sm:$0xff]  ;;  %v64_v22 = vld [vmem:[%s2139_s1 + $0x198] sm:$0xff]  ;;  %v53_v23 = vld [vmem:[%s2139_s1 + $0x140] sm:$0xff] }
   0x9   :  { %180 = vmatpush.msrb.mxu1 %v67_v13  ;;  %219 = vmatpush.msra.mxu3 %v72_v14  ;;  %v54_v24 = vld [vmem:[%s2139_s1 + $0x148] sm:$0xff]  ;;  %v55_v25 = vld [vmem:[%s2139_s1 + $0x150] sm:$0xff]  ;;  %v60_v26 = vld [vmem:[%s2139_s1 + $0x178] sm:$0xff] }
   0xa   :  { %141 = vmatpush.msra.mxu2 %v62_v16  ;;  %102 = vmatpush.msra.mxu0 %v57_v19  ;;  %v49_v27 = vld [vmem:[%s2139_s1 + $0x120] sm:$0xff]  ;;  %v50_v28 = vld [vmem:[%s2139_s1 + $0x128] sm:$0xff]  ;;  %v51_v29 = vld [vmem:[%s2139_s1 + $0x130] sm:$0xff] }
   0xb   :  { %181 = vmatpush.msrb.mxu1 %v63_v17  ;;  %220 = vmatpush.msra.mxu3 %v68_v18  ;;  %v56_v30 = vld [vmem:[%s2139_s1 + $0x158] sm:$0xff]  ;;  %v45_v31 = vld [vmem:[%s2139_s1 + $0x100] sm:$0xff]  ;;  %v46_v32 = vld [vmem:[%s2139_s1 + $0x108] sm:$0xff] }
   0xc   :  { %142 = vmatpush.msra.mxu2 %v58_v20  ;;  %103 = vmatpush.msra.mxu0 %v53_v23  ;;  %v47_v33 = vld [vmem:[%s2139_s1 + $0x110] sm:$0xff]  ;;  %v52_v34 = vld [vmem:[%s2139_s1 + $0x138] sm:$0xff]  ;;  %v41_v35 = vld [vmem:[%s2139_s1 + $0xe0] sm:$0xff] }
   0xd   :  { %182 = vmatpush.msrb.mxu1 %v59_v21  ;;  %221 = vmatpush.msra.mxu3 %v64_v22  ;;  %v42_v36 = vld [vmem:[%s2139_s1 + $0xe8] sm:$0xff]  ;;  %v43_v37 = vld [vmem:[%s2139_s1 + $0xf0] sm:$0xff]  ;;  %v48_v38 = vld [vmem:[%s2139_s1 + $0x118] sm:$0xff] }
   0xe   :  { %143 = vmatpush.msra.mxu2 %v54_v24  ;;  %104 = vmatpush.msra.mxu0 %v49_v27  ;;  %v37_v39 = vld [vmem:[%s2139_s1 + $0xc0] sm:$0xff]  ;;  %v38_v40 = vld [vmem:[%s2139_s1 + $0xc8] sm:$0xff]  ;;  %v39_v41 = vld [vmem:[%s2139_s1 + $0xd0] sm:$0xff] }
   0xf   :  { %183 = vmatpush.msrb.mxu1 %v55_v25  ;;  %222 = vmatpush.msra.mxu3 %v60_v26  ;;  %v44_v42 = vld [vmem:[%s2139_s1 + $0xf8] sm:$0xff]  ;;  %v33_v43 = vld [vmem:[%s2139_s1 + $0xa0] sm:$0xff]  ;;  %v34_v44 = vld [vmem:[%s2139_s1 + $0xa8] sm:$0xff] }
  0x10   :  { %144 = vmatpush.msra.mxu2 %v50_v28  ;;  %105 = vmatpush.msra.mxu0 %v45_v31  ;;  %v35_v45 = vld [vmem:[%s2139_s1 + $0xb0] sm:$0xff]  ;;  %v40_v46 = vld [vmem:[%s2139_s1 + $0xd8] sm:$0xff]  ;;  %v29_v47 = vld [vmem:[%s2139_s1 + $0x80] sm:$0xff] }
  0x11   :  { %184 = vmatpush.msrb.mxu1 %v51_v29  ;;  %223 = vmatpush.msra.mxu3 %v56_v30  ;;  %v30_v48 = vld [vmem:[%s2139_s1 + $0x88] sm:$0xff]  ;;  %v31_v49 = vld [vmem:[%s2139_s1 + $0x90] sm:$0xff]  ;;  %v36_v50 = vld [vmem:[%s2139_s1 + $0xb8] sm:$0xff] }
  0x12   :  { %145 = vmatpush.msra.mxu2 %v46_v32  ;;  %106 = vmatpush.msra.mxu0 %v41_v35  ;;  %v25_v51 = vld [vmem:[%s2139_s1 + $0x60] sm:$0xff]  ;;  %v26_v52 = vld [vmem:[%s2139_s1 + $0x68] sm:$0xff]  ;;  %v32_v53 = vld [vmem:[%s2139_s1 + $0x98] sm:$0xff] }
  0x13   :  { %185 = vmatpush.msrb.mxu1 %v47_v33  ;;  %224 = vmatpush.msra.mxu3 %v52_v34  ;;  %v27_v54 = vld [vmem:[%s2139_s1 + $0x70] sm:$0xff]  ;;  %v21_v55 = vld [vmem:[%s2139_s1 + $0x40] sm:$0xff]  ;;  %v22_v56 = vld [vmem:[%s2139_s1 + $0x48] sm:$0xff] }
  0x14   :  { %146 = vmatpush.msra.mxu2 %v42_v36  ;;  %107 = vmatpush.msra.mxu0 %v37_v39  ;;  %v28_v57 = vld [vmem:[%s2139_s1 + $0x78] sm:$0xff]  ;;  %v23_v58 = vld [vmem:[%s2139_s1 + $0x50] sm:$0xff]  ;;  %v17_v59 = vld [vmem:[%s2139_s1 + $0x20] sm:$0xff] }
  0x15   :  { %186 = vmatpush.msrb.mxu1 %v43_v37  ;;  %225 = vmatpush.msra.mxu3 %v48_v38  ;;  %v18_v60 = vld [vmem:[%s2139_s1 + $0x28] sm:$0xff]  ;;  %v24_v61 = vld [vmem:[%s2139_s1 + $0x58] sm:$0xff]  ;;  %v19_v62 = vld [vmem:[%s2139_s1 + $0x30] sm:$0xff] }
  0x16   :  { %147 = vmatpush.msra.mxu2 %v38_v40  ;;  %108 = vmatpush.msra.mxu0 %v33_v43  ;;  %v13_v63 = vld [vmem:[%s2139_s1] sm:$0xff]  ;;  %v14_v0 = vld [vmem:[%s2139_s1 + $0x8] sm:$0xff]  ;;  %v20_v1 = vld [vmem:[%s2139_s1 + $0x38] sm:$0xff] }
  0x17   :  { %187 = vmatpush.msrb.mxu1 %v39_v41  ;;  %226 = vmatpush.msra.mxu3 %v44_v42  ;;  %v11_v2 = vld [vmem:[%s2140_s0] sm:$0xff]  ;;  %v15_v3 = vld [vmem:[%s2139_s1 + $0x10] sm:$0xff]  ;;  %v80_v4 = vld [vmem:[%s2139_s1 + $0x218] sm:$0x3f] }
  0x18   :  { %148 = vmatpush.msra.mxu2 %v34_v44  ;;  %109 = vmatpush.msra.mxu0 %v29_v47  ;;  %v16_v5 = vld [vmem:[%s2139_s1 + $0x18] sm:$0xff]  ;;  %v307_v6 = vld [vmem:[%s2139_s1 + $0x400] sm:$0xff]  ;;  %v356_v34 = vld [vmem:[%s2139_s1 + $0x608] sm:$0xff] }
  0x19   :  { %188 = vmatpush.msrb.mxu1 %v35_v45  ;;  %227 = vmatpush.msra.mxu3 %v40_v46  ;;  %v355_v7 = vld [vmem:[%s2139_s1 + $0x600] sm:$0xff]  ;;  %v353_v35 = vld [vmem:[%s2139_s1 + $0x5e8] sm:$0xff] }
  0x1a   :  { %149 = vmatpush.msra.mxu2 %v30_v48  ;;  %110 = vmatpush.msra.mxu0 %v25_v51  ;;  %v403_v9 = vld [vmem:[%s2139_s1 + $0x800] sm:$0xff]  ;;  %v350_v38 = vld [vmem:[%s2139_s1 + $0x5c8] sm:$0xff] }
  0x1b   :  { %189 = vmatpush.msrb.mxu1 %v31_v49  ;;  %228 = vmatpush.msra.mxu3 %v36_v50  ;;  %v304_v10 = vld [vmem:[%s2139_s1 + $0x3e0] sm:$0xff]  ;;  %v347_v41 = vld [vmem:[%s2139_s1 + $0x5a8] sm:$0xff] }
  0x1c   :  { %1109 = vmatmul.msk.f32.vlgmr.msra.gmra.mxu1 %vm81_vm1, %v1209_v8  ;;  %150 = vmatpush.msra.mxu2 %v26_v52  ;;  %v352_v11 = vld [vmem:[%s2139_s1 + $0x5e0] sm:$0xff]  ;;  %v308_v45 = vld [vmem:[%s2139_s1 + $0x408] sm:$0xff] }
  0x1d   :  { %229 = vmatpush.msra.mxu3 %v32_v53  ;;  %190 = vmatpush.msrb.mxu1 %v27_v54  ;;  %v400_v12 = vld [vmem:[%s2139_s1 + $0x7e0] sm:$0xff]  ;;  %v344_v46 = vld [vmem:[%s2139_s1 + $0x588] sm:$0xff] }
  0x1e   :  { %1113 = vmatmul.msk.f32.vlgmr.msrb.gmra.mxu3 %vm81_vm1, %v1209_v8  ;;  %111 = vmatpush.msra.mxu0 %v21_v55  ;;  %v301_v13 = vld [vmem:[%s2139_s1 + $0x3c0] sm:$0xff]  ;;  %v305_v49 = vld [vmem:[%s2139_s1 + $0x3e8] sm:$0xff] }
  0x1f   :  { %151 = vmatpush.msra.mxu2 %v22_v56  ;;  %230 = vmatpush.msra.mxu3 %v28_v57  ;;  %v349_v14 = vld [vmem:[%s2139_s1 + $0x5c0] sm:$0xff]  ;;  %v341_v50 = vld [vmem:[%s2139_s1 + $0x568] sm:$0xff] }
  0x20   :  { %191 = vmatpush.msrb.mxu1 %v23_v58  ;;  %112 = vmatpush.msra.mxu0 %v17_v59  ;;  %v298_v15 = vld [vmem:[%s2139_s1 + $0x3a0] sm:$0xff]  ;;  %v302_v53 = vld [vmem:[%s2139_s1 + $0x3c8] sm:$0xff] }
  0x21   :  { %152 = vmatpush.msra.mxu2 %v18_v60  ;;  %231 = vmatpush.msra.mxu3 %v24_v61  ;;  %v346_v16 = vld [vmem:[%s2139_s1 + $0x5a0] sm:$0xff]  ;;  %v338_v54 = vld [vmem:[%s2139_s1 + $0x548] sm:$0xff] }
  0x22   :  { %192 = vmatpush.msrb.mxu1 %v19_v62  ;;  %113 = vmatpush.msra.mxu0 %v13_v63  ;;  %v295_v17 = vld [vmem:[%s2139_s1 + $0x380] sm:$0xff]  ;;  %v299_v57 = vld [vmem:[%s2139_s1 + $0x3a8] sm:$0xff] }
  0x23   :  { %153 = vmatpush.msra.mxu2 %v14_v0  ;;  %232 = vmatpush.msra.mxu3 %v20_v1  ;;  %v343_v18 = vld [vmem:[%s2139_s1 + $0x580] sm:$0xff]  ;;  %v335_v58 = vld [vmem:[%s2139_s1 + $0x528] sm:$0xff] }
  0x24   :  { %114 = vmatmul.f32.vlgmr.msra.gmra.mxu0 %v11_v2  ;;  %154 = vmatmul.f32.vlgmr.msra.gmra.mxu2 %v11_v2  ;;  %v292_v19 = vld [vmem:[%s2139_s1 + $0x360] sm:$0xff]  ;;  %v404_v59 = vld [vmem:[%s2139_s1 + $0x808] sm:$0xff] }
  0x25   :  { %193 = vmatpush.msrb.mxu1 %v15_v3  ;;  %1114 = vmatpush.msk.msrb.mxu0 %vm85_vm0, %v80_v4  ;;  %v289_v20 = vld [vmem:[%s2139_s1 + $0x340] sm:$0xff]  ;;  %v296_v61 = vld [vmem:[%s2139_s1 + $0x388] sm:$0xff] }
  0x26   :  { %194 = vmatmul.f32.vlgmr.msrb.gmra.mxu1 %v11_v2  ;;  %233 = vmatpush.msra.mxu3 %v16_v5  ;;  %v337_v21 = vld [vmem:[%s2139_s1 + $0x540] sm:$0xff]  ;;  %v332_v62 = vld [vmem:[%s2139_s1 + $0x508] sm:$0xff] }
  0x27   :  { %234 = vmatmul.f32.vlgmr.msra.gmra.mxu3 %v11_v2  ;;  %423 = vmatpush.msrb.mxu2 %v307_v6  ;;  %v286_v22 = vld [vmem:[%s2139_s1 + $0x320] sm:$0xff]  ;;  %v401_v63 = vld [vmem:[%s2139_s1 + $0x7e8] sm:$0xff] }
  0x28   :  { %443 = vmatpush.msra.mxu1 %v355_v7  ;;  %463 = vmatpush.msra.mxu0 %v403_v9  ;;  %v334_v23 = vld [vmem:[%s2139_s1 + $0x520] sm:$0xff]  ;;  %v293_v1 = vld [vmem:[%s2139_s1 + $0x368] sm:$0xff] }
  0x29   :  { %424 = vmatpush.msrb.mxu2 %v304_v10  ;;  %v283_v24 = vld [vmem:[%s2139_s1 + $0x300] sm:$0xff]  ;;  %v329_v2 = vld [vmem:[%s2139_s1 + $0x4e8] sm:$0xff] }
  0x2a   :  { %444 = vmatpush.msra.mxu1 %v352_v11  ;;  %464 = vmatpush.msra.mxu0 %v400_v12  ;;  %v331_v25 = vld [vmem:[%s2139_s1 + $0x500] sm:$0xff]  ;;  %v398_v3 = vld [vmem:[%s2139_s1 + $0x7c8] sm:$0xff] }
  0x2b   :  { %425 = vmatpush.msrb.mxu2 %v301_v13  ;;  %v280_v26 = vld [vmem:[%s2139_s1 + $0x2e0] sm:$0xff]  ;;  %v290_v5 = vld [vmem:[%s2139_s1 + $0x348] sm:$0xff] }
  0x2c   :  { %1115 = vmatmul.msk.f32.vlgmr.msrb.gmra.mxu0 %vm81_vm1, %v1209_v8  ;;  %445 = vmatpush.msra.mxu1 %v349_v14  ;;  %v340_v8 = vld [vmem:[%s2139_s1 + $0x560] sm:$0xff]  ;;  %v326_v6 = vld [vmem:[%s2139_s1 + $0x4c8] sm:$0xff] }
  0x2d   :  { %426 = vmatpush.msrb.mxu2 %v298_v15  ;;  %v328_v27 = vld [vmem:[%s2139_s1 + $0x4e0] sm:$0xff]  ;;  %v395_v7 = vld [vmem:[%s2139_s1 + $0x7a8] sm:$0xff] }
  0x2e   :  { %446 = vmatpush.msra.mxu1 %v346_v16  ;;  %v277_v28 = vld [vmem:[%s2139_s1 + $0x2c0] sm:$0xff]  ;;  %v287_v10 = vld [vmem:[%s2139_s1 + $0x328] sm:$0xff] }
  0x2f   :  { %427 = vmatpush.msrb.mxu2 %v295_v17  ;;  %v274_v29 = vld [vmem:[%s2139_s1 + $0x2a0] sm:$0xff]  ;;  %v323_v11 = vld [vmem:[%s2139_s1 + $0x4a8] sm:$0xff] }
  0x30   :  { %447 = vmatpush.msra.mxu1 %v343_v18  ;;  %v271_v30 = vld [vmem:[%s2139_s1 + $0x280] sm:$0xff]  ;;  %v392_v12 = vld [vmem:[%s2139_s1 + $0x788] sm:$0xff] }
  0x31   :  { %428 = vmatpush.msrb.mxu2 %v292_v19  ;;  %v268_v31 = vld [vmem:[%s2139_s1 + $0x260] sm:$0xff]  ;;  %v284_v14 = vld [vmem:[%s2139_s1 + $0x308] sm:$0xff] }
  0x32   :  { %448 = vmatpush.msra.mxu1 %v340_v8  ;;  %v265_v32 = vld [vmem:[%s2139_s1 + $0x240] sm:$0xff]  ;;  %v320_v15 = vld [vmem:[%s2139_s1 + $0x488] sm:$0xff] }
  0x33   :  { %429 = vmatpush.msrb.mxu2 %v289_v20  ;;  %v262_v33 = vld [vmem:[%s2139_s1 + $0x220] sm:$0xff]  ;;  %v389_v16 = vld [vmem:[%s2139_s1 + $0x768] sm:$0xff] }
  0x34   :  { %449 = vmatpush.msra.mxu1 %v337_v21  ;;  %v325_v36 = vld [vmem:[%s2139_s1 + $0x4c0] sm:$0xff]  ;;  %v281_v18 = vld [vmem:[%s2139_s1 + $0x2e8] sm:$0xff] }
  0x35   :  { %430 = vmatpush.msrb.mxu2 %v286_v22  ;;  %v397_v37 = vld [vmem:[%s2139_s1 + $0x7c0] sm:$0xff]  ;;  %v317_v19 = vld [vmem:[%s2139_s1 + $0x468] sm:$0xff] }
  0x36   :  { %450 = vmatpush.msra.mxu1 %v334_v23  ;;  %465 = vmatpush.msra.mxu0 %v397_v37  ;;  %v322_v39 = vld [vmem:[%s2139_s1 + $0x4a0] sm:$0xff]  ;;  %v386_v8 = vld [vmem:[%s2139_s1 + $0x748] sm:$0xff] }
  0x37   :  { %431 = vmatpush.msrb.mxu2 %v283_v24  ;;  %v394_v40 = vld [vmem:[%s2139_s1 + $0x7a0] sm:$0xff]  ;;  %v278_v21 = vld [vmem:[%s2139_s1 + $0x2c8] sm:$0xff] }
  0x38   :  { %451 = vmatpush.msra.mxu1 %v331_v25  ;;  %v319_v42 = vld [vmem:[%s2139_s1 + $0x480] sm:$0xff]  ;;  %466 = vmatpush.msra.mxu0 %v394_v40  ;;  %v314_v22 = vld [vmem:[%s2139_s1 + $0x448] sm:$0xff] }
  0x39   :  { %432 = vmatpush.msrb.mxu2 %v280_v26  ;;  %v406_v43 = vld [vmem:[%s2139_s1 + $0x820] sm:$0x1]  ;;  %v383_v23 = vld [vmem:[%s2139_s1 + $0x728] sm:$0xff] }
  0x3a   :  { %452 = vmatpush.msra.mxu1 %v328_v27  ;;  %v391_v44 = vld [vmem:[%s2139_s1 + $0x780] sm:$0xff]  ;;  %1116 = vmatpush.msk.msrb.mxu3 %vm413_vm2, %v406_v43  ;;  %v275_v25 = vld [vmem:[%s2139_s1 + $0x2a8] sm:$0xff] }
  0x3b   :  { %433 = vmatpush.msrb.mxu2 %v277_v28  ;;  %v316_v47 = vld [vmem:[%s2139_s1 + $0x460] sm:$0xff]  ;;  %467 = vmatpush.msra.mxu0 %v391_v44  ;;  %v311_v26 = vld [vmem:[%s2139_s1 + $0x428] sm:$0xff] }
  0x3c   :  { %453 = vmatpush.msra.mxu1 %v325_v36  ;;  %v388_v48 = vld [vmem:[%s2139_s1 + $0x760] sm:$0xff]  ;;  %503 = vmatpush.msra.mxu3 %v308_v45  ;;  %v380_v27 = vld [vmem:[%s2139_s1 + $0x708] sm:$0xff] }
  0x3d   :  { %434 = vmatpush.msrb.mxu2 %v274_v29  ;;  %v313_v51 = vld [vmem:[%s2139_s1 + $0x440] sm:$0xff]  ;;  %468 = vmatpush.msra.mxu0 %v388_v48  ;;  %v407_v28 = vld [vmem:[%s2139_s1 + $0x828] sm:$0x1]  ;;  %v405_v48 = vld [vmem:[%s2139_s1 + $0x810] sm:$0xff] }
  0x3e   :  { %454 = vmatpush.msra.mxu1 %v322_v39  ;;  %v385_v52 = vld [vmem:[%s2139_s1 + $0x740] sm:$0xff]  ;;  %504 = vmatpush.msra.mxu3 %v305_v49  ;;  %v272_v29 = vld [vmem:[%s2139_s1 + $0x288] sm:$0xff] }
  0x3f   :  { %435 = vmatpush.msrb.mxu2 %v271_v30  ;;  %v310_v55 = vld [vmem:[%s2139_s1 + $0x420] sm:$0xff]  ;;  %469 = vmatpush.msra.mxu0 %v385_v52  ;;  %v377_v30 = vld [vmem:[%s2139_s1 + $0x6e8] sm:$0xff] }
  0x40   :  { %455 = vmatpush.msra.mxu1 %v319_v42  ;;  %v382_v56 = vld [vmem:[%s2139_s1 + $0x720] sm:$0xff]  ;;  %505 = vmatpush.msra.mxu3 %v302_v53  ;;  %v368_v36 = vld [vmem:[%s2139_s1 + $0x688] sm:$0xff] }
  0x41   :  { %436 = vmatpush.msrb.mxu2 %v268_v31  ;;  %v379_v60 = vld [vmem:[%s2139_s1 + $0x700] sm:$0xff]  ;;  %470 = vmatpush.msra.mxu0 %v382_v56  ;;  %v269_v31 = vld [vmem:[%s2139_s1 + $0x268] sm:$0xff] }
  0x42   :  { %456 = vmatpush.msra.mxu1 %v316_v47  ;;  %506 = vmatpush.msra.mxu3 %v299_v57  ;;  %v376_v0 = vld [vmem:[%s2139_s1 + $0x6e0] sm:$0xff]  ;;  %v365_v37 = vld [vmem:[%s2139_s1 + $0x668] sm:$0xff] }
  0x43   :  { %437 = vmatpush.msrb.mxu2 %v265_v32  ;;  %471 = vmatpush.msra.mxu0 %v379_v60  ;;  %v373_v4 = vld [vmem:[%s2139_s1 + $0x6c0] sm:$0xff]  ;;  %v374_v32 = vld [vmem:[%s2139_s1 + $0x6c8] sm:$0xff]  ;;  %v396_v60 = vld [vmem:[%s2139_s1 + $0x7b0] sm:$0xff] }
  0x44   :  { %457 = vmatpush.msra.mxu1 %v313_v51  ;;  %507 = vmatpush.msra.mxu3 %v296_v61  ;;  %v370_v9 = vld [vmem:[%s2139_s1 + $0x6a0] sm:$0xff]  ;;  %v359_v39 = vld [vmem:[%s2139_s1 + $0x628] sm:$0xff]  ;;  %v402_v51 = vld [vmem:[%s2139_s1 + $0x7f0] sm:$0xff] }
  0x45   :  { %438 = vmatpush.msrb.mxu2 %v262_v33  ;;  %472 = vmatpush.msra.mxu0 %v376_v0  ;;  %v367_v13 = vld [vmem:[%s2139_s1 + $0x680] sm:$0xff]  ;;  %v266_v33 = vld [vmem:[%s2139_s1 + $0x248] sm:$0xff] }
  0x46   :  { %458 = vmatpush.msra.mxu1 %v310_v55  ;;  %508 = vmatpush.msra.mxu3 %v293_v1  ;;  %v364_v17 = vld [vmem:[%s2139_s1 + $0x660] sm:$0xff]  ;;  %v399_v55 = vld [vmem:[%s2139_s1 + $0x7d0] sm:$0xff] }
  0x47   :  { %523 = vmatpush.msra.mxu2 %v356_v34  ;;  %473 = vmatpush.msra.mxu0 %v373_v4  ;;  %v361_v20 = vld [vmem:[%s2139_s1 + $0x640] sm:$0xff]  ;;  %v371_v34 = vld [vmem:[%s2139_s1 + $0x6a8] sm:$0xff]  ;;  %v357_v1 = vld [vmem:[%s2139_s1 + $0x610] sm:$0xff] }
  0x48   :  { %543 = vmatpush.msrb.mxu1 %v404_v59  ;;  %509 = vmatpush.msra.mxu3 %v290_v5  ;;  %v358_v24 = vld [vmem:[%s2139_s1 + $0x620] sm:$0xff]  ;;  %v303_v59 = vld [vmem:[%s2139_s1 + $0x3d0] sm:$0xff] }
  0x49   :  { %524 = vmatpush.msra.mxu2 %v353_v35  ;;  %474 = vmatpush.msra.mxu0 %v370_v9  ;;  %v263_v35 = vld [vmem:[%s2139_s1 + $0x228] sm:$0xff]  ;;  %v354_v4 = vld [vmem:[%s2139_s1 + $0x5f0] sm:$0xff] }
  0x4a   :  { %544 = vmatpush.msrb.mxu1 %v401_v63  ;;  %510 = vmatpush.msra.mxu3 %v287_v10  ;;  %v300_v63 = vld [vmem:[%s2139_s1 + $0x3b0] sm:$0xff] }
  0x4b   :  { %525 = vmatpush.msra.mxu2 %v350_v38  ;;  %475 = vmatpush.msra.mxu0 %v367_v13  ;;  %v362_v38 = vld [vmem:[%s2139_s1 + $0x648] sm:$0xff]  ;;  %v390_v5 = vld [vmem:[%s2139_s1 + $0x770] sm:$0xff] }
  0x4c   :  { %545 = vmatpush.msrb.mxu1 %v398_v3  ;;  %511 = vmatpush.msra.mxu3 %v284_v14  ;;  %v297_v3 = vld [vmem:[%s2139_s1 + $0x390] sm:$0xff] }
  0x4d   :  { %526 = vmatpush.msra.mxu2 %v347_v41  ;;  %476 = vmatpush.msra.mxu0 %v364_v17  ;;  %v387_v9 = vld [vmem:[%s2139_s1 + $0x750] sm:$0xff] }
  0x4e   :  { %546 = vmatpush.msrb.mxu1 %v395_v7  ;;  %512 = vmatpush.msra.mxu3 %v281_v18  ;;  %v351_v7 = vld [vmem:[%s2139_s1 + $0x5d0] sm:$0xff] }
  0x4f   :  { %527 = vmatpush.msra.mxu2 %v344_v46  ;;  %477 = vmatpush.msra.mxu0 %v361_v20  ;;  %v291_v10 = vld [vmem:[%s2139_s1 + $0x350] sm:$0xff] }
  0x50   :  { %547 = vmatpush.msrb.mxu1 %v392_v12  ;;  %513 = vmatpush.msra.mxu3 %v278_v21  ;;  %v384_v12 = vld [vmem:[%s2139_s1 + $0x730] sm:$0xff] }
  0x51   :  { %528 = vmatpush.msra.mxu2 %v341_v50  ;;  %478 = vmatpush.msra.mxu0 %v358_v24  ;;  %v309_v50 = vld [vmem:[%s2139_s1 + $0x410] sm:$0xff] }
  0x52   :  { %548 = vmatpush.msrb.mxu1 %v389_v16  ;;  %514 = vmatpush.msra.mxu3 %v275_v25  ;;  %v288_v13 = vld [vmem:[%s2139_s1 + $0x330] sm:$0xff] }
  0x53   :  { %529 = vmatpush.msra.mxu2 %v338_v54  ;;  %1118 = vmatpush.msk.msrb.mxu0 %vm413_vm2, %v407_v28  ;;  %v306_v54 = vld [vmem:[%s2139_s1 + $0x3f0] sm:$0xff] }
  0x54   :  { %549 = vmatpush.msrb.mxu1 %v386_v8  ;;  %515 = vmatpush.msra.mxu3 %v272_v29  ;;  %v345_v14 = vld [vmem:[%s2139_s1 + $0x590] sm:$0xff] }
  0x55   :  { %530 = vmatpush.msra.mxu2 %v335_v58  ;;  %v285_v16 = vld [vmem:[%s2139_s1 + $0x310] sm:$0xff] }
  0x56   :  { %550 = vmatpush.msrb.mxu1 %v383_v23  ;;  %516 = vmatpush.msra.mxu3 %v269_v31  ;;  %v342_v17 = vld [vmem:[%s2139_s1 + $0x570] sm:$0xff] }
  0x57   :  { %531 = vmatpush.msra.mxu2 %v332_v62  ;;  %v408_v62 = vld [vmem:[%s2139_s1 + $0x830] sm:$0x1] }
  0x58   :  { %551 = vmatpush.msrb.mxu1 %v380_v27  ;;  %517 = vmatpush.msra.mxu3 %v266_v33  ;;  %v378_v18 = vld [vmem:[%s2139_s1 + $0x6f0] sm:$0xff] }
  0x59   :  { %532 = vmatpush.msra.mxu2 %v329_v2  ;;  %v393_v2 = vld [vmem:[%s2139_s1 + $0x790] sm:$0xff] }
  0x5a   :  { %552 = vmatpush.msrb.mxu1 %v377_v30  ;;  %518 = vmatpush.msra.mxu3 %v263_v35  ;;  %v339_v8 = vld [vmem:[%s2139_s1 + $0x550] sm:$0xff] }
  0x5b   :  { %533 = vmatpush.msra.mxu2 %v326_v6  ;;  %v294_v6 = vld [vmem:[%s2139_s1 + $0x370] sm:$0xff] }
  0x5c   :  { %553 = vmatpush.msrb.mxu1 %v374_v32  ;;  %v375_v20 = vld [vmem:[%s2139_s1 + $0x6d0] sm:$0xff] }
  0x5d   :  { %534 = vmatpush.msra.mxu2 %v323_v11  ;;  %v348_v11 = vld [vmem:[%s2139_s1 + $0x5b0] sm:$0xff] }
  0x5e   :  { %554 = vmatpush.msrb.mxu1 %v371_v34  ;;  %v279_v21 = vld [vmem:[%s2139_s1 + $0x2d0] sm:$0xff] }
  0x5f   :  { %535 = vmatpush.msra.mxu2 %v320_v15  ;;  %v381_v15 = vld [vmem:[%s2139_s1 + $0x710] sm:$0xff] }
  0x60   :  { %555 = vmatpush.msrb.mxu1 %v368_v36  ;;  %v372_v23 = vld [vmem:[%s2139_s1 + $0x6b0] sm:$0xff] }
  0x61   :  { %536 = vmatpush.msra.mxu2 %v317_v19  ;;  %v282_v19 = vld [vmem:[%s2139_s1 + $0x2f0] sm:$0xff] }
  0x62   :  { %556 = vmatpush.msrb.mxu1 %v365_v37  ;;  %v276_v24 = vld [vmem:[%s2139_s1 + $0x2b0] sm:$0xff] }
  0x63   :  { %537 = vmatpush.msra.mxu2 %v314_v22  ;;  %v336_v22 = vld [vmem:[%s2139_s1 + $0x530] sm:$0xff] }
  0x64   :  { %557 = vmatpush.msrb.mxu1 %v362_v38  ;;  %v333_v25 = vld [vmem:[%s2139_s1 + $0x510] sm:$0xff] }
  0x65   :  { %538 = vmatpush.msra.mxu2 %v311_v26  ;;  %v369_v26 = vld [vmem:[%s2139_s1 + $0x690] sm:$0xff] }
  0x66   :  { %558 = vmatpush.msrb.mxu1 %v359_v39  ;;  %v273_v27 = vld [vmem:[%s2139_s1 + $0x290] sm:$0xff] }
  0x67   :  { %v330_v28 = vld [vmem:[%s2139_s1 + $0x4f0] sm:$0xff] }
  0x68   :  { %v366_v29 = vld [vmem:[%s2139_s1 + $0x670] sm:$0xff] }
  0x69   :  { %v270_v30 = vld [vmem:[%s2139_s1 + $0x270] sm:$0xff] }
  0x6a   :  { %v327_v31 = vld [vmem:[%s2139_s1 + $0x4d0] sm:$0xff] }
  0x6b   :  { %v363_v32 = vld [vmem:[%s2139_s1 + $0x650] sm:$0xff] }
  0x6c   :  { %v267_v33 = vld [vmem:[%s2139_s1 + $0x250] sm:$0xff] }
  0x6d   :  { %v324_v34 = vld [vmem:[%s2139_s1 + $0x4b0] sm:$0xff] }
  0x6e   :  { %v360_v35 = vld [vmem:[%s2139_s1 + $0x630] sm:$0xff] }
  0x6f   :  { %v264_v36 = vld [vmem:[%s2139_s1 + $0x230] sm:$0xff] }
  0x70   :  { %v321_v37 = vld [vmem:[%s2139_s1 + $0x490] sm:$0xff] }
  0x71   :  { %v318_v38 = vld [vmem:[%s2139_s1 + $0x470] sm:$0xff] }
  0x72   :  { %v315_v39 = vld [vmem:[%s2139_s1 + $0x450] sm:$0xff] }
  0x89   :  { %v175_v40 = vpop.f32.mrf.mxu3 }
  0x99   :  { %v135_v41 = vpop.f32.mrf.mxu1 }
  0xa1   :  { %v115_v42 = vpop.f32.mrf.mxu0  ;;  %v215_v43 = vpop.f32.mrf.mxu3 }
  0xa2   :  { %v136_v44 = vadd.f32 %v135_v41, %v115_v42 }
  0xa3   :  { %v195_v45 = vpop.f32.mrf.mxu1 }
  0xa4   :  { %v1700_v46 = vmax.f32 %v136_v44, 0.0  ;;  %v216_v47 = vadd.f32 %v215_v43, %v195_v45 }
  0xa6   :  { %v1705_v49 = vmax.f32 %v216_v47, 0.0  ;;  %439 = vmatmul.f32.vlgmr.msrb.gmra.mxu2 %v1700_v46 }
  0xa7   :  { %623 = vmatpush.msrb.mxu2 %v405_v48  ;;  %v155_v52 = vpop.f32.mrf.mxu2 }
  0xa8   :  { %v176_v53 = vadd.f32 %v175_v40, %v155_v52  ;;  %479 = vmatmul.f32.vlgmr.msra.gmra.mxu0 %v1705_v49  ;;  %v312_v40 = vld [vmem:[%s2139_s1 + $0x430] sm:$0xff] }
  0xa9   :  { %583 = vmatpush.msra.mxu0 %v309_v50  ;;  %624 = vmatpush.msrb.mxu2 %v402_v51  ;;  %v255_v56 = vpop.f32.mrf.mxu0 }
  0xaa   :  { %v1721_v57 = vmax.f32 %v176_v53, 0.0  ;;  %v235_v58 = vpop.f32.mrf.mxu3 }
  0xab   :  { %v256_v61 = vadd.f32 %v255_v56, %v235_v58  ;;  %584 = vmatpush.msra.mxu0 %v306_v54  ;;  %625 = vmatpush.msrb.mxu2 %v399_v55  ;;  %v673_v56 = vld [vmem:[%s2139_s1 + $0x840] sm:$0x3f]  ;;  %v676_v58 = vld [vmem:[%s2139_s1 + $0x858] sm:$0x3f] }
  0xac   :  { %459 = vmatmul.f32.vlgmr.msra.gmra.mxu1 %v1721_v57 }
  0xad   :  { %v261_v0 = vmax.f32 %v256_v61, 0.0  ;;  %585 = vmatpush.msra.mxu0 %v303_v59  ;;  %626 = vmatpush.msrb.mxu2 %v396_v60 }
  0xae   :  { %539 = vmatmul.f32.vlgmr.msra.gmra.mxu2 %v1721_v57  ;;  %1120 = vmatpush.msk.msra.mxu1 %vm413_vm2, %v408_v62 }
  0xaf   :  { %586 = vmatpush.msra.mxu0 %v300_v63  ;;  %1117 = vmatmul.msk.f32.vlgmr.msrb.gmra.mxu3 %vm409_vm3, %v261_v0  ;;  %v675_v63 = vld [vmem:[%s2139_s1 + $0x850] sm:$0x3f] }
  0xb0   :  { %603 = vmatpush.msrb.mxu3 %v357_v1  ;;  %627 = vmatpush.msrb.mxu2 %v393_v2 }
  0xb1   :  { %1119 = vmatmul.msk.f32.vlgmr.msrb.gmra.mxu0 %vm409_vm3, %v261_v0 }
  0xb2   :  { %587 = vmatpush.msra.mxu0 %v297_v3  ;;  %604 = vmatpush.msrb.mxu3 %v354_v4 }
  0xb3   :  { %628 = vmatpush.msrb.mxu2 %v390_v5 }
  0xb4   :  { %588 = vmatpush.msra.mxu0 %v294_v6  ;;  %605 = vmatpush.msrb.mxu3 %v351_v7 }
  0xb5   :  { %629 = vmatpush.msrb.mxu2 %v387_v9  ;;  %559 = vmatmul.f32.vlgmr.msrb.gmra.mxu1 %v1705_v49 }
  0xb6   :  { %589 = vmatpush.msra.mxu0 %v291_v10  ;;  %606 = vmatpush.msrb.mxu3 %v348_v11 }
  0xb7   :  { %630 = vmatpush.msrb.mxu2 %v384_v12  ;;  %519 = vmatmul.f32.vlgmr.msra.gmra.mxu3 %v1700_v46 }
  0xb8   :  { %590 = vmatpush.msra.mxu0 %v288_v13  ;;  %607 = vmatpush.msrb.mxu3 %v345_v14 }
  0xb9   :  { %631 = vmatpush.msrb.mxu2 %v381_v15  ;;  %1122 = vmatpush.msk.msrb.mxu1 %vm85_vm0, %v673_v56  ;;  %v872_v56 = vld [vmem:[%s2139_s1 + $0xbc0] sm:$0xff] }
  0xba   :  { %591 = vmatpush.msra.mxu0 %v285_v16  ;;  %608 = vmatpush.msrb.mxu3 %v342_v17 }
  0xbb   :  { %632 = vmatpush.msrb.mxu2 %v378_v18  ;;  %v810_v18 = vld [vmem:[%s2139_s1 + $0xa40] sm:$0xff] }
  0xbc   :  { %592 = vmatpush.msra.mxu0 %v282_v19  ;;  %609 = vmatpush.msrb.mxu3 %v339_v8  ;;  %v809_v19 = vld [vmem:[%s2139_s1 + $0xa20] sm:$0xff] }
  0xbd   :  { %633 = vmatpush.msrb.mxu2 %v375_v20  ;;  %1121 = vmatmul.msk.f32.vlgmr.msra.gmra.mxu1 %vm409_vm3, %v261_v0  ;;  %v808_v8 = vld [vmem:[%s2139_s1 + $0xa00] sm:$0xff] }
  0xbe   :  { %593 = vmatpush.msra.mxu0 %v279_v21  ;;  %610 = vmatpush.msrb.mxu3 %v336_v22  ;;  %v807_v20 = vld [vmem:[%s2139_s1 + $0x9e0] sm:$0xff] }
  0xbf   :  { %634 = vmatpush.msrb.mxu2 %v372_v23  ;;  %1126 = vmatpush.msk.msra.mxu1 %vm85_vm0, %v675_v63  ;;  %v806_v21 = vld [vmem:[%s2139_s1 + $0x9c0] sm:$0xff] }
  0xc0   :  { %594 = vmatpush.msra.mxu0 %v276_v24  ;;  %611 = vmatpush.msrb.mxu3 %v333_v25  ;;  %v805_v22 = vld [vmem:[%s2139_s1 + $0x9a0] sm:$0xff] }
  0xc1   :  { %635 = vmatpush.msrb.mxu2 %v369_v26  ;;  %v819_v23 = vld [vmem:[%s2139_s1 + $0xb60] sm:$0x1] }
  0xc2   :  { %595 = vmatpush.msra.mxu0 %v273_v27  ;;  %612 = vmatpush.msrb.mxu3 %v330_v28  ;;  %v804_v24 = vld [vmem:[%s2139_s1 + $0x980] sm:$0xff] }
  0xc3   :  { %636 = vmatpush.msrb.mxu2 %v366_v29  ;;  %v818_v25 = vld [vmem:[%s2139_s1 + $0xb40] sm:$0xff] }
  0xc4   :  { %596 = vmatpush.msra.mxu0 %v270_v30  ;;  %613 = vmatpush.msrb.mxu3 %v327_v31  ;;  %v803_v26 = vld [vmem:[%s2139_s1 + $0x960] sm:$0xff] }
  0xc5   :  { %637 = vmatpush.msrb.mxu2 %v363_v32  ;;  %v802_v27 = vld [vmem:[%s2139_s1 + $0x940] sm:$0xff] }
  0xc6   :  { %597 = vmatpush.msra.mxu0 %v267_v33  ;;  %614 = vmatpush.msrb.mxu3 %v324_v34  ;;  %v801_v28 = vld [vmem:[%s2139_s1 + $0x920] sm:$0xff] }
  0xc7   :  { %638 = vmatpush.msrb.mxu2 %v360_v35  ;;  %v817_v29 = vld [vmem:[%s2139_s1 + $0xb20] sm:$0xff] }
  0xc8   :  { %598 = vmatpush.msra.mxu0 %v264_v36  ;;  %639 = vmatmul.f32.vlgmr.msrb.gmra.mxu2 %v1705_v49  ;;  %v800_v30 = vld [vmem:[%s2139_s1 + $0x900] sm:$0xff] }
  0xc9   :  { %599 = vmatmul.f32.vlgmr.msra.gmra.mxu0 %v1700_v46  ;;  %615 = vmatpush.msrb.mxu3 %v321_v37  ;;  %v816_v31 = vld [vmem:[%s2139_s1 + $0xb00] sm:$0xff] }
  0xca   :  { %v815_v32 = vld [vmem:[%s2139_s1 + $0xae0] sm:$0xff] }
  0xcb   :  { %616 = vmatpush.msrb.mxu3 %v318_v38  ;;  %v799_v33 = vld [vmem:[%s2139_s1 + $0x8e0] sm:$0xff] }
  0xcc   :  { %v814_v34 = vld [vmem:[%s2139_s1 + $0xac0] sm:$0xff] }
  0xcd   :  { %617 = vmatpush.msrb.mxu3 %v315_v39  ;;  %v798_v35 = vld [vmem:[%s2139_s1 + $0x8c0] sm:$0xff] }
  0xce   :  { %v797_v36 = vld [vmem:[%s2139_s1 + $0x8a0] sm:$0xff] }
  0xcf   :  { %618 = vmatpush.msrb.mxu3 %v312_v40  ;;  %v813_v37 = vld [vmem:[%s2139_s1 + $0xaa0] sm:$0xff] }
  0xd0   :  { %619 = vmatmul.f32.vlgmr.msrb.gmra.mxu3 %v1721_v57  ;;  %v674_v57 = vld [vmem:[%s2139_s1 + $0x848] sm:$0x3f]  ;;  %v796_v38 = vld [vmem:[%s2139_s1 + $0x880] sm:$0xff] }
  0xd1   :  { %1124 = vmatpush.msk.msrb.mxu0 %vm85_vm0, %v674_v57  ;;  %1128 = vmatpush.msk.msra.mxu3 %vm85_vm0, %v676_v58  ;;  %v812_v39 = vld [vmem:[%s2139_s1 + $0xa80] sm:$0xff] }
  0xd2   :  { %v795_v40 = vld [vmem:[%s2139_s1 + $0x860] sm:$0xff] }
  0xd3   :  { %827 = vmatpush.msra.mxu0 %v810_v18  ;;  %v870_v57 = vld [vmem:[%s2139_s1 + $0xba0] sm:$0xff] }
  0xd4   :  { %v868_v58 = vld [vmem:[%s2139_s1 + $0xb80] sm:$0xff] }
  0xd5   :  { %828 = vmatpush.msra.mxu0 %v809_v19 }
  0xd7   :  { %829 = vmatpush.msra.mxu0 %v808_v8 }
  0xd9   :  { %830 = vmatpush.msra.mxu0 %v807_v20 }
  0xdb   :  { %831 = vmatpush.msra.mxu0 %v806_v21 }
  0xdd   :  { %832 = vmatpush.msra.mxu0 %v805_v22  ;;  %v947_v22 = vld [vmem:[%s2139_s1 + $0xd80] sm:$0xff] }
  0xdf   :  { %833 = vmatpush.msra.mxu0 %v804_v24  ;;  %v945_v24 = vld [vmem:[%s2139_s1 + $0xd40] sm:$0xff] }
  0xe1   :  { %834 = vmatpush.msra.mxu0 %v803_v26  ;;  %v943_v26 = vld [vmem:[%s2139_s1 + $0xd00] sm:$0xff] }
  0xe3   :  { %835 = vmatpush.msra.mxu0 %v802_v27  ;;  %v942_v27 = vld [vmem:[%s2139_s1 + $0xce0] sm:$0xff] }
  0xe5   :  { %836 = vmatpush.msra.mxu0 %v801_v28  ;;  %v941_v28 = vld [vmem:[%s2139_s1 + $0xcc0] sm:$0xff] }
  0xe7   :  { %837 = vmatpush.msra.mxu0 %v800_v30 }
  0xe9   :  { %838 = vmatpush.msra.mxu0 %v799_v33  ;;  %v940_v33 = vld [vmem:[%s2139_s1 + $0xca0] sm:$0xff] }
  0xeb   :  { %839 = vmatpush.msra.mxu0 %v798_v35 }
  0xed   :  { %840 = vmatpush.msra.mxu0 %v797_v36  ;;  %v1058_v36 = vld [vmem:[%s2139_s1 + $0x1020] sm:$0xff] }
  0xef   :  { %841 = vmatpush.msra.mxu0 %v796_v38  ;;  %v1056_v38 = vld [vmem:[%s2139_s1 + $0xfe0] sm:$0xff] }
  0xf1   :  { %842 = vmatpush.msra.mxu0 %v795_v40  ;;  %v1054_v40 = vld [vmem:[%s2139_s1 + $0xfa0] sm:$0xff] }
 0x125   :  { %v480_v44 = vpop.f32.mrf.mxu0 }
 0x129   :  { %v440_v41 = vpop.f32.mrf.mxu2  ;;  %v460_v42 = vpop.f32.mrf.mxu1 }
 0x12a   :  { %v461_v43 = vadd.f32 %v460_v42, %v440_v41  ;;  %v811_v41 = vld [vmem:[%s2139_s1 + $0xa60] sm:$0xff] }
 0x12b   :  { %v884_v42 = vld [vmem:[%s2139_s1 + $0xc80] sm:$0x1] }
 0x12c   :  { %v481_v45 = vadd.f32 %v480_v44, %v461_v43  ;;  %v882_v43 = vld [vmem:[%s2139_s1 + $0xc60] sm:$0xff]  ;;  %1132 = vmatpush.msk.msrb.mxu3 %vm413_vm2, %v884_v42  ;;  %v885_v44 = vld [vmem:[%s2139_s1 + $0xc88] sm:$0x1] }
 0x12d   :  { %1134 = vmatpush.msk.msra.mxu2 %vm413_vm2, %v885_v44  ;;  %v1052_v42 = vld [vmem:[%s2139_s1 + $0xf60] sm:$0xff] }
 0x12e   :  { %v580_v53 = vpop.f32.mrf.mxu0  ;;  %903 = vmatpush.msrb.mxu3 %v882_v43  ;;  %v1051_v43 = vld [vmem:[%s2139_s1 + $0xf40] sm:$0xff] }
 0x12f   :  { %v1050_v44 = vld [vmem:[%s2139_s1 + $0xf20] sm:$0xff] }
 0x131   :  { %v540_v48 = vpop.f32.mrf.mxu2 }
 0x132   :  { %v500_v46 = vpop.f32.mrf.mxu3  ;;  %v560_v51 = vpop.f32.mrf.mxu1 }
 0x133   :  { %v1866_v47 = vadd.f32 %v500_v46, %v481_v45  ;;  %v880_v45 = vld [vmem:[%s2139_s1 + $0xc40] sm:$0xff]  ;;  %v883_v46 = vld [vmem:[%s2139_s1 + $0xc68] sm:$0xff] }
 0x134   :  { %923 = vmatpush.msra.mxu2 %v883_v46  ;;  %904 = vmatpush.msrb.mxu3 %v880_v45  ;;  %v1049_v46 = vld [vmem:[%s2139_s1 + $0xf00] sm:$0xff] }
 0x13a   :  { %v520_v49 = vpop.f32.mrf.mxu3  ;;  %v660_v1 = vpop.f32.mrf.mxu1 }
 0x13b   :  { %v541_v50 = vadd.f32 %v540_v48, %v520_v49  ;;  %v881_v48 = vld [vmem:[%s2139_s1 + $0xc48] sm:$0xff]  ;;  %v878_v49 = vld [vmem:[%s2139_s1 + $0xc20] sm:$0xff] }
 0x13c   :  { %924 = vmatpush.msra.mxu2 %v881_v48  ;;  %905 = vmatpush.msrb.mxu3 %v878_v49  ;;  %v1048_v49 = vld [vmem:[%s2139_s1 + $0xee0] sm:$0xff] }
 0x13d   :  { %v561_v52 = vadd.f32 %v560_v51, %v541_v50  ;;  %v879_v50 = vld [vmem:[%s2139_s1 + $0xc28] sm:$0xff]  ;;  %v876_v51 = vld [vmem:[%s2139_s1 + $0xc00] sm:$0xff] }
 0x13e   :  { %925 = vmatpush.msra.mxu2 %v879_v50  ;;  %906 = vmatpush.msrb.mxu3 %v876_v51  ;;  %v1047_v50 = vld [vmem:[%s2139_s1 + $0xec0] sm:$0xff] }
 0x13f   :  { %v1868_v54 = vadd.f32 %v580_v53, %v561_v52  ;;  %v877_v52 = vld [vmem:[%s2139_s1 + $0xc08] sm:$0xff]  ;;  %v874_v53 = vld [vmem:[%s2139_s1 + $0xbe0] sm:$0xff] }
 0x140   :  { %926 = vmatpush.msra.mxu2 %v877_v52  ;;  %907 = vmatpush.msrb.mxu3 %v874_v53 }
 0x141   :  { %v667_v55 = vsel %vm666_vm4, %v1868_v54, -inf  ;;  %v664_v16 = vmax.f32 %v1868_v54, 0.0 }
 0x142   :  { %668 = vmax.xlane.f32.xlu0 %v667_v55  ;;  %v875_v55 = vld [vmem:[%s2139_s1 + $0xbe8] sm:$0xff]  ;;  %908 = vmatpush.msrb.mxu3 %v872_v56 }
 0x143   :  { %927 = vmatpush.msra.mxu2 %v875_v55 }
 0x144   :  { %909 = vmatpush.msrb.mxu3 %v870_v57 }
 0x146   :  { %v600_v2 = vpop.f32.mrf.mxu0  ;;  %910 = vmatpush.msrb.mxu3 %v868_v58 }
 0x14b   :  { %v640_v11 = vpop.f32.mrf.mxu2 }
 0x153   :  { %v620_v3 = vpop.f32.mrf.mxu3 }
 0x154   :  { %v621_v10 = vadd.f32 %v620_v3, %v600_v2  ;;  %v663_v2 = vmax.f32 %v1866_v47, 0.0  ;;  %v1005_v47 = vld [vmem:[%s2139_s1 + $0xe60] sm:$0xff] }
 0x156   :  { %v641_v13 = vadd.f32 %v640_v11, %v621_v10  ;;  %v873_v10 = vld [vmem:[%s2139_s1 + $0xbc8] sm:$0xff]  ;;  %v1003_v11 = vld [vmem:[%s2139_s1 + $0xe20] sm:$0xff] }
 0x157   :  { %928 = vmatpush.msra.mxu2 %v873_v10 }
 0x158   :  { %v661_v15 = vadd.f32 %v660_v1, %v641_v13  ;;  %v1001_v13 = vld [vmem:[%s2139_s1 + $0xde0] sm:$0xff] }
 0x15a   :  { %v665_v17 = vmax.f32 %v661_v15, 0.0  ;;  %v999_v15 = vld [vmem:[%s2139_s1 + $0xda0] sm:$0xff] }
 0x1b5   :  { %v669_v59 = vpop.xlane.xlu0 %668 }
 0x1b6   :  { %v670_v60 = vsub.f32 %v1868_v54, %v669_v59  ;;  %v1004_v54 = vld [vmem:[%s2139_s1 + $0xe40] sm:$0xff] }
 0x1b8   :  { %v671_v61 = vmul.f32 1.442695, %v670_v60  ;;  %v1007_v60 = vld [vmem:[%s2139_s1 + $0xea0] sm:$0x1] }
 0x1ba   :  { %1146 = vpow2.f32 %v671_v61  ;;  %v1006_v61 = vld [vmem:[%s2139_s1 + $0xe80] sm:$0xff] }
 0x1c0   :  { %v1147_v62 = vpop.eup %1146 }
 0x1c1   :  { %678 = vrot.lane.b32.xlu0 %v1147_v62, %s1162_s18 }
 0x233   :  { %v679_v0 = vpop.permute.xlu0 %678 }
 0x234   :  { %1123 = vmatmul.msk.f32.vlgmr.msrb.gmra.mxu1 %vm81_vm1, %v679_v0  ;;  %1125 = vmatmul.msk.f32.vlgmr.msrb.gmra.mxu0 %vm81_vm1, %v679_v0 }
 0x235   :  { %1129 = vmatmul.msk.f32.vlgmr.msra.gmra.mxu3 %vm81_vm1, %v679_v0  ;;  %1130 = vmatpush.msk.msrb.mxu1 %vm413_vm2, %v819_v23  ;;  %v946_v23 = vld [vmem:[%s2139_s1 + $0xd60] sm:$0xff] }
 0x236   :  { %1139 = vmatpush.msk.msra.mxu3 %vm413_vm2, %v1007_v60 }
 0x237   :  { %855 = vmatpush.msrb.mxu1 %v818_v25  ;;  %v944_v25 = vld [vmem:[%s2139_s1 + $0xd20] sm:$0xff] }
 0x238   :  { %1029 = vmatpush.msra.mxu3 %v1006_v61 }
 0x239   :  { %856 = vmatpush.msrb.mxu1 %v817_v29 }
 0x23a   :  { %1030 = vmatpush.msra.mxu3 %v1005_v47 }
 0x23b   :  { %857 = vmatpush.msrb.mxu1 %v816_v31 }
 0x23c   :  { %1127 = vmatmul.msk.f32.vlgmr.msra.gmra.mxu1 %vm81_vm1, %v679_v0  ;;  %1031 = vmatpush.msra.mxu3 %v1004_v54  ;;  %vm1102_vm1 = vcmask 31744  }
 0x23d   :  { %858 = vmatpush.msrb.mxu1 %v815_v32 }
 0x23e   :  { %1032 = vmatpush.msra.mxu3 %v1003_v11 }
 0x23f   :  { %859 = vmatpush.msrb.mxu1 %v814_v34 }
 0x241   :  { %860 = vmatpush.msrb.mxu1 %v813_v37  ;;  %v1057_v37 = vld [vmem:[%s2139_s1 + $0x1000] sm:$0xff] }
 0x243   :  { %861 = vmatpush.msrb.mxu1 %v812_v39  ;;  %v1055_v39 = vld [vmem:[%s2139_s1 + $0xfc0] sm:$0xff] }
 0x245   :  { %862 = vmatpush.msrb.mxu1 %v811_v41  ;;  %v1053_v41 = vld [vmem:[%s2139_s1 + $0xf80] sm:$0xff] }
 0x247   :  { %960 = vmatpush.msra.mxu1 %v947_v22 }
 0x249   :  { %961 = vmatpush.msra.mxu1 %v946_v23 }
 0x24b   :  { %962 = vmatpush.msra.mxu1 %v945_v24 }
 0x24d   :  { %963 = vmatpush.msra.mxu1 %v944_v25 }
 0x24f   :  { %964 = vmatpush.msra.mxu1 %v943_v26 }
 0x251   :  { %965 = vmatpush.msra.mxu1 %v942_v27 }
 0x253   :  { %966 = vmatpush.msra.mxu1 %v941_v28 }
 0x255   :  { %967 = vmatpush.msra.mxu1 %v940_v33 }
 0x2b1   :  { %v1892_v4 = vpop.f32.mrf.mxu1  ;;  %v1894_v5 = vpop.f32.mrf.mxu0 }
 0x2b2   :  { %1148 = vrcp.f32 %v1894_v5 }
 0x2b8   :  { %v1149_v6 = vpop.eup %1148  ;;  %v771_v7 = vpop.f32.mrf.mxu3 }
 0x2b9   :  { %1150 = vrcp.f32 %v771_v7  ;;  %780 = vrot.lane.b32.xlu1 %v1149_v6, %s1162_s18  ;;  %v751_v9 = vpop.f32.mrf.mxu1 }
 0x2ba   :  { %1152 = vrcp.f32 %v751_v9 }
 0x2bf   :  { %v1151_v12 = vpop.eup %1150 }
 0x2c0   :  { %v1153_v14 = vpop.eup %1152  ;;  %784 = vrot.lane.b32.xlu2 %v1151_v12, %s1162_s18  ;;  %v1002_v12 = vld [vmem:[%s2139_s1 + $0xe00] sm:$0xff] }
 0x2c1   :  { %782 = vrot.lane.b32.xlu1 %v1153_v14, %s1162_s18  ;;  %1033 = vmatpush.msra.mxu3 %v1002_v12  ;;  %v1000_v14 = vld [vmem:[%s2139_s1 + $0xdc0] sm:$0xff] }
 0x2c3   :  { %1034 = vmatpush.msra.mxu3 %v1001_v13 }
 0x2c5   :  { %1035 = vmatpush.msra.mxu3 %v1000_v14 }
 0x2c7   :  { %1036 = vmatpush.msra.mxu3 %v999_v15 }
 0x2c8   :  { %1010 = vrot.lane.b32.xlu2 %v664_v16, %s1163_s21 }
 0x2c9   :  { %1012 = vrot.lane.b32.xlu1 %v665_v17, %s1163_s21 }
 0x31a   :  { %v785_v62 = vpop.permute.xlu2 %784 }
 0x322   :  { %v1011_v20 = vpop.permute.xlu2 %1010 }
 0x32b   :  { %v781_v59 = vpop.permute.xlu1 %780 }
 0x333   :  { %v783_v63 = vpop.permute.xlu1 %782 }
 0x334   :  { %v787_v0 = vsel %vm786_vm5, %v781_v59, %v783_v63  ;;  %v788_v1 = vsel %vm786_vm5, %v783_v63, %v785_v62 }
 0x335   :  { %v791_v3 = vmul.f32 %v787_v0, %v1892_v4  ;;  %v792_v6 = vmul.f32 %v788_v1, %v1894_v5  ;;  %v871_v4 = vld [vmem:[%s2139_s1 + $0xba8] sm:$0xff] }
 0x336   :  { %v869_v5 = vld [vmem:[%s2139_s1 + $0xb88] sm:$0xff]  ;;  %929 = vmatpush.msra.mxu2 %v871_v4 }
 0x337   :  { %v793_v7 = vmul.f32 %v791_v3, %v663_v2  ;;  %v794_v9 = vmul.f32 %v792_v6, %v664_v16 }
 0x338   :  { %930 = vmatpush.msra.mxu2 %v869_v5 }
 0x339   :  { %843 = vmatmul.f32.vlgmr.msra.gmra.mxu0 %v793_v7  ;;  %1131 = vmatmul.msk.f32.vlgmr.msrb.gmra.mxu1 %vm820_vm6, %v794_v9 }
 0x33a   :  { %1067 = vmatpush.msrb.mxu2 %v1058_v36 }
 0x33b   :  { %v1013_v8 = vpop.permute.xlu1 %1012 }
 0x33c   :  { %v1015_v21 = vsel %vm1014_vm7, %v1011_v20, %v1013_v8  ;;  %1068 = vmatpush.msrb.mxu2 %v1057_v37 }
 0x33e   :  { %1069 = vmatpush.msrb.mxu2 %v1056_v38 }
 0x340   :  { %1070 = vmatpush.msrb.mxu2 %v1055_v39 }
 0x342   :  { %1071 = vmatpush.msrb.mxu2 %v1054_v40 }
 0x344   :  { %1072 = vmatpush.msrb.mxu2 %v1053_v41 }
 0x346   :  { %1073 = vmatpush.msrb.mxu2 %v1052_v42 }
 0x348   :  { %1074 = vmatpush.msrb.mxu2 %v1051_v43 }
 0x34a   :  { %1075 = vmatpush.msrb.mxu2 %v1050_v44 }
 0x34c   :  { %1076 = vmatpush.msrb.mxu2 %v1049_v46 }
 0x34e   :  { %1077 = vmatpush.msrb.mxu2 %v1048_v49 }
 0x350   :  { %1078 = vmatpush.msrb.mxu2 %v1047_v50 }
 0x3b6   :  { %v844_v16 = vpop.f32.mrf.mxu0  ;;  %v864_v17 = vpop.f32.mrf.mxu1 }
 0x3b7   :  { %v865_v18 = vadd.f32 %v864_v17, %v844_v16 }
 0x3b9   :  { %v2066_v19 = vmax.f32 %v865_v18, 0.0 }
 0x3bb   :  { %1133 = vmatmul.msk.f32.vlgmr.msrb.gmra.mxu3 %vm820_vm6, %v2066_v19  ;;  %1135 = vmatmul.msk.f32.vlgmr.msra.gmra.mxu2 %vm820_vm6, %v2066_v19 }
 0x3c3   :  { %1140 = vmatmul.msk.f32.vlgmr.msra.gmra.mxu3 %vm820_vm6, %v1015_v21 }
 0x43e   :  { %v912_v29 = vpop.f32.mrf.mxu3  ;;  %v932_v30 = vpop.f32.mrf.mxu2 }
 0x43f   :  { %993 = vrot.lane.b32.xlu1 %v932_v30, %s1164_s24  ;;  %936 = vrot.lane.b32.xlu2 %v912_v29, %s1164_s24 }
 0x446   :  { %v1038_v31 = vpop.f32.mrf.mxu3 }
 0x447   :  { %v1041_v32 = vmax.f32 %v1038_v31, 0.0 }
 0x449   :  { %1043 = vrot.lane.b32.xlu2 %v1041_v32, %s1164_s24 }
 0x499   :  { %v937_v34 = vpop.permute.xlu2 %936 }
 0x49a   :  { %v939_v35 = vmul.f32 %v937_v34, %v912_v29 }
 0x49c   :  { %1136 = vmatmul.msk.f32.vlgmr.msra.gmra.mxu1 %vm948_vm8, %v939_v35 }
 0x4a3   :  { %v1044_v7 = vpop.permute.xlu2 %1043 }
 0x4b1   :  { %v994_v1 = vpop.permute.xlu1 %993 }
 0x519   :  { %v969_v45 = vpop.f32.mrf.mxu1 }
 0x51a   :  { %v1137_v48 = vmul.f32 -1.442695, %v969_v45 }
 0x51c   :  { %1154 = vpow2.f32 %v1137_v48 }
 0x522   :  { %v1155_v51 = vpop.eup %1154 }
 0x523   :  { %v975_v52 = vadd.f32 1.0, %v1155_v51 }
 0x525   :  { %1156 = vrcp.f32 %v975_v52  ;;  %v987_v57 = vand.u32 2147483648, %v975_v52  ;;  %v985_v59 = vand.u32 2147483647, %v975_v52  ;;  %vm981_vm10 = vweird.f32 %v975_v52 }
 0x527   :  { %v988_v61 = vor.u32 1.1754944e-38, %v987_v57  ;;  %vm986_vm12 = vcmp.eq.f32.partialorder %v985_v59, 8.507059e+37 }
 0x52b   :  { %v1157_v53 = vpop.eup %1156 }
 0x52c   :  { %v977_v55 = vmul.f32 %v1157_v53, %v975_v52  ;;  %vm982_vm9 = vweird.f32 %v1157_v53 }
 0x52d   :  { %vm983_vm11 = vmor %vm981_vm10, %vm982_vm9 }
 0x52e   :  { %v978_v56 = vsub.f32 1.0, %v977_v55 }
 0x530   :  { %v979_v58 = vmul.f32 %v1157_v53, %v978_v56 }
 0x532   :  { %v980_v60 = vadd.f32 %v1157_v53, %v979_v58 }
 0x534   :  { %v984_v62 = vsel %vm983_vm11, %v1157_v53, %v980_v60 }
 0x535   :  { %v989_v63 = vsel %vm986_vm12, %v988_v61, %v984_v62 }
 0x536   :  { %v1138_v0 = vadd.f32 -1.0, %v989_v63 }
 0x538   :  { %v996_v2 = vmul.f32 %v1138_v0, %v994_v1 }
 0x53a   :  { %v997_v3 = vadd.f32 %v996_v2, %v932_v30 }
 0x53c   :  { %v998_v6 = vadd.f32 %v997_v3, %v2066_v19 }
 0x53e   :  { %v1046_v9 = vsel %vm948_vm8, %v998_v6, %v1044_v7 }
 0x53f   :  { %1141 = vmatmul.msk.f32.vlgmr.msrb.gmra.mxu2 %vm1059_vm13, %v1046_v9 }
 0x5c2   :  { %v1080_v10 = vpop.f32.mrf.mxu2 }
 0x5c3   :  { %v1142_v47 = vmul.f32 -1.442695, %v1080_v10 }
 0x5c5   :  { %1158 = vpow2.f32 %v1142_v47 }
 0x5cb   :  { %v1159_v4 = vpop.eup %1158 }
 0x5cc   :  { %v1086_v54 = vadd.f32 1.0, %v1159_v4 }
 0x5ce   :  { %1160 = vrcp.f32 %v1086_v54  ;;  %v1098_v13 = vand.u32 2147483648, %v1086_v54  ;;  %v1096_v15 = vand.u32 2147483647, %v1086_v54  ;;  %vm1092_vm15 = vweird.f32 %v1086_v54 }
 0x5d0   :  { %v1099_v17 = vor.u32 1.1754944e-38, %v1098_v13  ;;  %vm1097_vm2 = vcmp.eq.f32.partialorder %v1096_v15, 8.507059e+37 }
 0x5d4   :  { %v1161_v5 = vpop.eup %1160 }
 0x5d5   :  { %v1088_v11 = vmul.f32 %v1161_v5, %v1086_v54  ;;  %vm1093_vm14 = vweird.f32 %v1161_v5 }
 0x5d6   :  { %vm1094_vm0 = vmor %vm1092_vm15, %vm1093_vm14 }
 0x5d7   :  { %v1089_v12 = vsub.f32 1.0, %v1088_v11 }
 0x5d9   :  { %v1090_v14 = vmul.f32 %v1161_v5, %v1089_v12 }
 0x5db   :  { %v1091_v16 = vadd.f32 %v1161_v5, %v1090_v14 }
 0x5dd   :  { %v1095_v18 = vsel %vm1094_vm0, %v1161_v5, %v1091_v16 }
 0x5de   :  { %v1100_v19 = vsel %vm1097_vm2, %v1099_v17, %v1095_v18 }
 0x5df   :  { %1103 = vst.msk [vmem:[%s2141_s2] sm:$0xff] %vm1102_vm1, %v1100_v19 }

</bundles_post_ra>
